<compile_context>
chip_gen: v7x
topology: tpu7x:2x2x1
jax: 0.10.0
libtpu: 0.0.40
codegen_flags: <defaults>
</compile_context>

<pallas_src>
import math

import jax
import jax.numpy as jnp
from jax.experimental import pallas as pl
from jax.experimental.pallas import tpu as pltpu

# ---------------- configuration ----------------
B = 2               # batch; also the unbatched nn.MultiheadAttention sequence length L
S = 100             # encoder sequence length (32 * 100 = 3200 = fc2.in_features)
D_ENC = 32          # encoder token dim (hard-coded 32 / dim_attn_s)
DIM_ATTN_E = 1      # EncoderLayer internal attention dim (argument shuffle in PFFN.__init__)
D_ATT = 8           # input_att_dim
N_HEADS_ATT = 8     # nn.MultiheadAttention(8, 8, 1) -> 8 heads
HEAD_DIM_ATT = D_ATT // N_HEADS_ATT     # = 1 -> attention scale 1/sqrt(1) == 1, skipped
LN_EPS = 1e-5
APPROX_RECIP = True  # set False for an exact-reciprocal softmax denominator (tighter numerics)

# packed weight-slab layout (every row is 32 lanes wide)
N_MATS = 6                       # w_enc_in, w_q(pad), w_k(pad), w_v, w_ao, w_fc1
OFF_VEC = N_MATS * D_ENC         # 192: 7 bias/LN rows + 1 pad row
OFF_F2R = OFF_VEC + 8            # 200: folded fc2+regressor weight, then positional encoding


def _rbp(bb):
    """Sublane-aligned (multiple of 8) size of a (bb*S)-row region inside the slab."""
    rb = bb * S
    return ((rb + 7) // 8) * 8


# ---------------- small helpers (used in-kernel and in the reference) ----------------
def _layernorm(x, gamma, beta):
    mu = jnp.mean(x, axis=-1, keepdims=True)
    var = jnp.mean((x - mu) ** 2, axis=-1, keepdims=True)
    return (x - mu) * jax.lax.rsqrt(var + LN_EPS) * gamma + beta


def _elu(x):
    return jnp.where(x > 0, x, jnp.exp(jnp.minimum(x, 0.0)) - 1.0)


# ---------------- the fused encoder-branch kernel ----------------
def make_pffn_encoder_kernel(bb):
    """Kernel over `bb` stacked batch elements: x_ref is (bb*S, 32), already NWC."""
    rb = bb * S
    off_pe = OFF_F2R + _rbp(bb)

    def kernel(x_ref, w_ref, out_ref):
        # static, sublane-aligned views into the packed weight slab
        w_in = w_ref[0 * D_ENC:1 * D_ENC, :]
        w_q = w_ref[1 * D_ENC:2 * D_ENC, :]
        w_k = w_ref[2 * D_ENC:3 * D_ENC, :]
        w_v = w_ref[3 * D_ENC:4 * D_ENC, :]
        w_ao = w_ref[4 * D_ENC:5 * D_ENC, :]
        w_fc1 = w_ref[5 * D_ENC:6 * D_ENC, :]
        b_in = w_ref[OFF_VEC + 0:OFF_VEC + 1, :]
        b_ao = w_ref[OFF_VEC + 1:OFF_VEC + 2, :]
        g1 = w_ref[OFF_VEC + 2:OFF_VEC + 3, :]
        be1 = w_ref[OFF_VEC + 3:OFF_VEC + 4, :]
        b_fc1 = w_ref[OFF_VEC + 4:OFF_VEC + 5, :]
        g2 = w_ref[OFF_VEC + 5:OFF_VEC + 6, :]
        be2 = w_ref[OFF_VEC + 6:OFF_VEC + 7, :]
        w_f2r = w_ref[OFF_F2R:OFF_F2R + rb, :]
        pe = w_ref[off_pe:off_pe + rb, :]

        # PFFN.encoder_enc_input_fc + PositionalEncoding
        x = x_ref[...]                                                     # (rb, 32)
        src = jnp.dot(x, w_in, preferred_element_type=jnp.float32) + b_in + pe

        # Encoder_MultiHeadAttention: one head, dim_attn = 1 (q/k weights zero-padded to
        # 32 columns host-side; extra columns contribute exactly zero to the scores).
        q = jnp.dot(src, w_q, preferred_element_type=jnp.float32)
        k = jnp.dot(src, w_k, preferred_element_type=jnp.float32)
        v = jnp.dot(src, w_v, preferred_element_type=jnp.float32)
        scores = jax.lax.dot_general(q, k, (((1,), (1,)), ((), ())),
                                     preferred_element_type=jnp.float32)  # (rb, rb)
        if bb > 1:  # block-diagonal mask: attention stays within each batch element
            r2 = jax.lax.broadcasted_iota(jnp.int32, (rb, rb), 0)
            c2 = jax.lax.broadcasted_iota(jnp.int32, (rb, rb), 1)
            same = (r2 >= S) == (c2 >= S)
            for m in range(2, bb):
                same = jnp.logical_and(same, (r2 >= m * S) == (c2 >= m * S))
            scores = jnp.where(same, scores, -1e30)
        # softmax (scale 1/sqrt(dim_attn=1) == 1 -> skipped)
        scores = scores - jnp.max(scores, axis=-1, keepdims=True)
        pexp = jnp.exp(scores)
        probs = pexp * pl.reciprocal(jnp.sum(pexp, axis=-1, keepdims=True),
                                     approx=APPROX_RECIP)
        head = jnp.dot(probs, v, preferred_element_type=jnp.float32)
        a = jnp.dot(head, w_ao, preferred_element_type=jnp.float32) + b_ao

        # EncoderLayer: norm1, fc1(elu(fc1(.))) with SHARED fc1 weights (as written in the
        # PyTorch code), norm2.  Dropout = identity (inference).
        fea = _layernorm(src + a, g1, be1)
        h = _elu(jnp.dot(fea, w_fc1, preferred_element_type=jnp.float32) + b_fc1)
        a2 = jnp.dot(h, w_fc1, preferred_element_type=jnp.float32) + b_fc1
        e = _layernorm(fea + a2, g2, be2)

        # Flatten + fc2 + regressor (encoder half), folded host-side into w_f2r:
        # reg_e[b] = sum over batch-b rows of (e * w_f2r): one rowsum + tiny selection matmul.
        rowsum = jnp.sum(e * w_f2r, axis=1, keepdims=True)                 # (rb, 1)
        rown = jax.lax.broadcasted_iota(jnp.int32, (bb, rb), 0)
        cpos = jax.lax.broadcasted_iota(jnp.int32, (bb, rb), 1)
        cbat = jnp.zeros((bb, rb), jnp.int32)
        for m in range(1, bb):
            cbat = cbat + (cpos >= m * S).astype(jnp.int32)
        sel = (cbat == rown).astype(jnp.float32)                           # (bb, rb) one-hot rows
        out_ref[...] = jnp.dot(sel, rowsum, preferred_element_type=jnp.float32)  # (bb, 1)

    return kernel


# ---------------- tiny (L=B, 8) attention branch: plain XLA (per perf review) ----------------
def att_branch_xla(fea_att, p):
    x = fea_att @ p["w_att_in"] + p["b_att_in"]
    q = x @ p["w_q_a"] + p["b_q_a"]
    k = x @ p["w_k_a"] + p["b_k_a"]
    v = x @ p["w_v_a"] + p["b_v_a"]
    qh = q.reshape(B, N_HEADS_ATT, HEAD_DIM_ATT)
    kh = k.reshape(B, N_HEADS_ATT, HEAD_DIM_ATT)
    vh = v.reshape(B, N_HEADS_ATT, HEAD_DIM_ATT)
    sc = jnp.einsum("ihd,jhd->hij", qh, kh)                 # head_dim = 1 -> scale 1
    pw = jax.nn.softmax(sc, axis=-1)
    ao = jnp.einsum("hij,jhd->ihd", pw, vh).reshape(B, D_ATT)
    a = ao @ p["w_o_a"] + p["b_o_a"]
    fea = _layernorm(x + a, p["g1_a"], p["be1_a"])
    h = _elu(fea @ p["w_f2_a"] + p["b_f2_a"])
    return _layernorm(fea + (h @ p["w_f1_a"] + p["b_f1_a"]), p["g2_a"], p["be2_a"])


# ---------------- wrapper: one pallas_call + tiny XLA epilogue ----------------
def build_pffn_forward(bb):
    rb = bb * S
    slab_rows = OFF_F2R + 2 * _rbp(bb)
    kernel = make_pffn_encoder_kernel(bb)

    if bb == 1:          # dual-TensorCore chips: one batch element per grid step, "parallel"
        grid = (B,)
        in_specs = [pl.BlockSpec((None, S, D_ENC), lambda b: (b, 0, 0)),
                    pl.BlockSpec((slab_rows, D_ENC), lambda b: (0, 0))]
        out_specs = pl.BlockSpec((None, 1, 1), lambda b: (b, 0, 0))
        out_shape = jax.ShapeDtypeStruct((B, 1, 1), jnp.float32)
        dims = ("parallel",)
    else:                # single-TensorCore chips: one grid step, batch stacked to (B*S, 32)
        grid = (1,)
        in_specs = [pl.BlockSpec((rb, D_ENC), lambda i: (0, 0)),
                    pl.BlockSpec((slab_rows, D_ENC), lambda i: (0, 0))]
        out_specs = pl.BlockSpec((B, 1), lambda i: (0, 0))
        out_shape = jax.ShapeDtypeStruct((B, 1), jnp.float32)
        dims = ("arbitrary",)

    enc_call = pl.pallas_call(
        kernel, grid=grid, in_specs=in_specs, out_specs=out_specs, out_shape=out_shape,
        compiler_params=pltpu.CompilerParams(dimension_semantics=dims))

    def forward(fea_encoder, fea_att, slab, p_att, w_reg_o, b_head):
        xt = jnp.transpose(fea_encoder, (0, 2, 1))           # NCW -> NWC, one cheap XLA op
        x_in = xt if bb == 1 else xt.reshape(rb, D_ENC)
        reg_e = enc_call(x_in, slab).reshape(B, 1)            # encoder branch (fused kernel)
        o_att = att_branch_xla(fea_att, p_att)                # (B, 8), plain XLA
        return reg_e + o_att @ w_reg_o + b_head

    return jax.jit(forward)


def _is_single_tensorcore_chip():
    try:
        kind = jax.devices()[0].device_kind.lower()
    except Exception:
        return False
    return any(t in kind for t in ("v5e", "v5 lite", "v5lite", "v6e", "v6 lite", "v6lite"))


# ---------------- parameter setup (deterministic) ----------------
def sinusoid_pe(n_pos, dim):
    pos = jnp.arange(n_pos, dtype=jnp.float32)[:, None]
    div = jnp.exp(jnp.arange(0, dim, 2, dtype=jnp.float32) * (-math.log(10000.0) / dim))
    pe = jnp.zeros((n_pos, dim), jnp.float32)
    pe = pe.at[:, 0::2].set(jnp.sin(pos * div))
    pe = pe.at[:, 1::2].set(jnp.cos(pos * div))
    return pe


def init_params(key):
    ks = iter(jax.random.split(key, 40))
    w = lambda shape, scale=0.1: (scale * jax.random.normal(next(ks), shape)).astype(jnp.float32)
    p = {}
    # encoder branch
    p["w_enc_in"] = w((D_ENC, D_ENC)); p["b_enc_in"] = w((1, D_ENC))
    p["w_q_e"] = w((D_ENC, DIM_ATTN_E)); p["w_k_e"] = w((D_ENC, DIM_ATTN_E))
    p["w_v_e"] = w((D_ENC, D_ENC))
    p["w_ao_e"] = w((D_ENC, D_ENC)); p["b_ao_e"] = w((1, D_ENC))
    p["g1_e"] = jnp.ones((1, D_ENC), jnp.float32); p["be1_e"] = jnp.zeros((1, D_ENC), jnp.float32)
    p["w_fc1_e"] = w((D_ENC, D_ENC)); p["b_fc1_e"] = w((1, D_ENC))
    p["g2_e"] = jnp.ones((1, D_ENC), jnp.float32); p["be2_e"] = jnp.zeros((1, D_ENC), jnp.float32)
    # attention branch
    p["w_att_in"] = w((D_ATT, D_ATT)); p["b_att_in"] = w((1, D_ATT))
    p["w_q_a"] = w((D_ATT, D_ATT)); p["b_q_a"] = w((1, D_ATT))
    p["w_k_a"] = w((D_ATT, D_ATT)); p["b_k_a"] = w((1, D_ATT))
    p["w_v_a"] = w((D_ATT, D_ATT)); p["b_v_a"] = w((1, D_ATT))
    p["w_o_a"] = w((D_ATT, D_ATT)); p["b_o_a"] = w((1, D_ATT))
    p["g1_a"] = jnp.ones((1, D_ATT), jnp.float32); p["be1_a"] = jnp.zeros((1, D_ATT), jnp.float32)
    p["w_f2_a"] = w((D_ATT, D_ATT)); p["b_f2_a"] = w((1, D_ATT))
    p["w_f1_a"] = w((D_ATT, D_ATT)); p["b_f1_a"] = w((1, D_ATT))
    p["g2_a"] = jnp.ones((1, D_ATT), jnp.float32); p["be2_a"] = jnp.zeros((1, D_ATT), jnp.float32)
    # head: fc2 (3200 -> 16) and regressor (24 -> 1), stored unfused (the reference uses these)
    p["w_big"] = w((S * D_ENC, 16), 0.02); p["b_big"] = w((1, 16))
    p["w_reg_e"] = w((16, 1)); p["w_reg_o"] = w((D_ATT, 1)); p["b_reg"] = w((1, 1))
    return p


def build_weight_slab(p, pe, bb):
    """Pack everything the kernel needs into one (rows, 32) f32 slab (host-side, once)."""
    rb, rbp = bb * S, _rbp(bb)
    pad_qk = D_ENC - DIM_ATTN_E
    mats = jnp.concatenate([
        p["w_enc_in"],
        jnp.pad(p["w_q_e"], ((0, 0), (0, pad_qk))),
        jnp.pad(p["w_k_e"], ((0, 0), (0, pad_qk))),
        p["w_v_e"], p["w_ao_e"], p["w_fc1_e"],
    ], axis=0)                                                           # (192, 32)
    vecs = jnp.concatenate([
        p["b_enc_in"], p["b_ao_e"], p["g1_e"], p["be1_e"],
        p["b_fc1_e"], p["g2_e"], p["be2_e"], jnp.zeros((1, D_ENC), jnp.float32),
    ], axis=0)                                                           # (8, 32)
    # fold fc2 + regressor[:16]:  flatten(e) @ w_big @ w_reg_e  ==  sum(e * w_fold)
    w_fold = (p["w_big"] @ p["w_reg_e"]).reshape(S, D_ENC)
    f2r = jnp.pad(jnp.tile(w_fold, (bb, 1)), ((0, rbp - rb), (0, 0)))
    pe_t = jnp.pad(jnp.tile(pe, (bb, 1)), ((0, rbp - rb), (0, 0)))
    return jnp.concatenate([mats, vecs, f2r, pe_t], axis=0)              # (200 + 2*rbp, 32)


# ---------------- pure-JAX reference (unfused) for validation ----------------
def pffn_reference(fea_encoder, fea_att, pe, p):
    xs = jnp.transpose(fea_encoder, (0, 2, 1))               # (B, S, 32)
    src = xs @ p["w_enc_in"] + p["b_enc_in"] + pe[None]
    q = src @ p["w_q_e"]; k = src @ p["w_k_e"]; v = src @ p["w_v_e"]
    sc = jnp.einsum("bsd,btd->bst", q, k)                    # dim_attn = 1 -> scale 1
    pw = jax.nn.softmax(sc, axis=-1)
    a = jnp.einsum("bst,btd->bsd", pw, v) @ p["w_ao_e"] + p["b_ao_e"]
    fea = _layernorm(src + a, p["g1_e"], p["be1_e"])
    h = _elu(fea @ p["w_fc1_e"] + p["b_fc1_e"])
    e = _layernorm(fea + (h @ p["w_fc1_e"] + p["b_fc1_e"]), p["g2_e"], p["be2_e"])
    e16 = e.reshape(B, -1) @ p["w_big"] + p["b_big"]
    o = att_branch_xla(fea_att, p)
    cat = jnp.concatenate([e16, o], axis=1)
    w_r = jnp.concatenate([p["w_reg_e"], p["w_reg_o"]], axis=0)
    return cat @ w_r + p["b_reg"]


if __name__ == "__main__":
    key = jax.random.PRNGKey(0)
    k_in1, k_in2, k_par = jax.random.split(key, 3)
    fea_encoder = jax.random.normal(k_in1, (B, D_ENC, S), jnp.float32)   # NCW, as in PyTorch
    fea_att = jax.random.normal(k_in2, (B, D_ATT), jnp.float32)          # unbatched (L=B, E)
    params = init_params(k_par)
    pe = sinusoid_pe(S, D_ENC)

    bb = B if _is_single_tensorcore_chip() else 1     # v5e/v6e: stack batch; v7x etc.: grid=(B,)
    pffn_forward = build_pffn_forward(bb)
    slab = build_weight_slab(params, pe, bb)
    att_keys = ("w_att_in", "b_att_in", "w_q_a", "b_q_a", "w_k_a", "b_k_a", "w_v_a", "b_v_a",
                "w_o_a", "b_o_a", "g1_a", "be1_a", "w_f2_a", "b_f2_a", "w_f1_a", "b_f1_a",
                "g2_a", "be2_a")
    p_att = {k: params[k] for k in att_keys}
    b_head = params["b_big"] @ params["w_reg_e"] + params["b_reg"]       # folded fc2/reg biases

    out = jax.block_until_ready(
        pffn_forward(fea_encoder, fea_att, slab, p_att, params["w_reg_o"], b_head))
    ref = jax.block_until_ready(pffn_reference(fea_encoder, fea_att, pe, params))

    assert out.shape == (B, 1), out.shape
    assert jnp.allclose(out, ref, atol=5e-2, rtol=5e-3), (out, ref)
    print("KERNEL_OK")
</pallas_src>

<mosaic_0001>
module attributes {stable_mosaic.version = 11 : i64} {
  func.func @kernel(%arg0: i32, %arg1: memref<1x100x32xf32, #tpu.memory_space<vmem>>, %arg2: memref<408x32xf32, #tpu.memory_space<vmem>>, %arg3: memref<1x1x1xf32, #tpu.memory_space<vmem>>) attributes {dimension_semantics = [#tpu.dimension_semantics<parallel>], iteration_bounds = array<i64: 2>, scalar_prefetch = 0 : i64, scratch_operands = 0 : i64, tpu.core_type = #tpu.core_type<tc>, window_params = [{transform_indices = @transform_0, window_bounds = array<i64: 1, 100, 32>}, {pipeline_mode = #tpu.pipeline_mode<synchronous>, transform_indices = @transform_1, window_bounds = array<i64: 408, 32>}, {transform_indices = @transform_2, window_bounds = array<i64: 1, 1, 1>}]} {
    %c0 = arith.constant 0 : index
    %c0_0 = arith.constant 0 : index
    %0 = vector.load %arg2[%c0, %c0_0] : memref<408x32xf32, #tpu.memory_space<vmem>>, vector<32x32xf32>
    %c32 = arith.constant 32 : index
    %c0_1 = arith.constant 0 : index
    %1 = vector.load %arg2[%c32, %c0_1] : memref<408x32xf32, #tpu.memory_space<vmem>>, vector<32x32xf32>
    %c64 = arith.constant 64 : index
    %c0_2 = arith.constant 0 : index
    %2 = vector.load %arg2[%c64, %c0_2] : memref<408x32xf32, #tpu.memory_space<vmem>>, vector<32x32xf32>
    %c96 = arith.constant 96 : index
    %c0_3 = arith.constant 0 : index
    %3 = vector.load %arg2[%c96, %c0_3] : memref<408x32xf32, #tpu.memory_space<vmem>>, vector<32x32xf32>
    %c128 = arith.constant 128 : index
    %c0_4 = arith.constant 0 : index
    %4 = vector.load %arg2[%c128, %c0_4] : memref<408x32xf32, #tpu.memory_space<vmem>>, vector<32x32xf32>
    %c160 = arith.constant 160 : index
    %c0_5 = arith.constant 0 : index
    %5 = vector.load %arg2[%c160, %c0_5] : memref<408x32xf32, #tpu.memory_space<vmem>>, vector<32x32xf32>
    %c192 = arith.constant 192 : index
    %c0_6 = arith.constant 0 : index
    %6 = vector.load %arg2[%c192, %c0_6] : memref<408x32xf32, #tpu.memory_space<vmem>>, vector<1x32xf32>
    %c193 = arith.constant 193 : index
    %c0_7 = arith.constant 0 : index
    %7 = vector.load %arg2[%c193, %c0_7] : memref<408x32xf32, #tpu.memory_space<vmem>>, vector<1x32xf32>
    %c194 = arith.constant 194 : index
    %c0_8 = arith.constant 0 : index
    %8 = vector.load %arg2[%c194, %c0_8] : memref<408x32xf32, #tpu.memory_space<vmem>>, vector<1x32xf32>
    %c195 = arith.constant 195 : index
    %c0_9 = arith.constant 0 : index
    %9 = vector.load %arg2[%c195, %c0_9] : memref<408x32xf32, #tpu.memory_space<vmem>>, vector<1x32xf32>
    %c196 = arith.constant 196 : index
    %c0_10 = arith.constant 0 : index
    %10 = vector.load %arg2[%c196, %c0_10] : memref<408x32xf32, #tpu.memory_space<vmem>>, vector<1x32xf32>
    %c197 = arith.constant 197 : index
    %c0_11 = arith.constant 0 : index
    %11 = vector.load %arg2[%c197, %c0_11] : memref<408x32xf32, #tpu.memory_space<vmem>>, vector<1x32xf32>
    %c198 = arith.constant 198 : index
    %c0_12 = arith.constant 0 : index
    %12 = vector.load %arg2[%c198, %c0_12] : memref<408x32xf32, #tpu.memory_space<vmem>>, vector<1x32xf32>
    %c200 = arith.constant 200 : index
    %c0_13 = arith.constant 0 : index
    %13 = vector.load %arg2[%c200, %c0_13] : memref<408x32xf32, #tpu.memory_space<vmem>>, vector<100x32xf32>
    %c304 = arith.constant 304 : index
    %c0_14 = arith.constant 0 : index
    %14 = vector.load %arg2[%c304, %c0_14] : memref<408x32xf32, #tpu.memory_space<vmem>>, vector<100x32xf32>
    %c0_15 = arith.constant 0 : index
    %c0_16 = arith.constant 0 : index
    %c0_17 = arith.constant 0 : index
    %15 = vector.load %arg1[%c0_15, %c0_16, %c0_17] : memref<1x100x32xf32, #tpu.memory_space<vmem>>, vector<1x100x32xf32>
    %16 = vector.shape_cast %15 : vector<1x100x32xf32> to vector<100x32xf32>
    %cst = arith.constant dense<0.000000e+00> : vector<100x32xf32>
    %17 = tpu.matmul %16, %0, %cst {dimension_numbers = #tpu.dot_dimension_numbers<[1], [0], [0], [1], [0, 0, 1, 1], [], []>} : vector<100x32xf32>, vector<32x32xf32>, vector<100x32xf32> -> vector<100x32xf32>
    %18 = vector.broadcast %6 : vector<1x32xf32> to vector<100x32xf32>
    %19 = arith.addf %17, %18 : vector<100x32xf32>
    %20 = arith.addf %19, %14 : vector<100x32xf32>
    %cst_18 = arith.constant dense<0.000000e+00> : vector<100x32xf32>
    %21 = tpu.matmul %20, %1, %cst_18 {dimension_numbers = #tpu.dot_dimension_numbers<[1], [0], [0], [1], [0, 0, 1, 1], [], []>} : vector<100x32xf32>, vector<32x32xf32>, vector<100x32xf32> -> vector<100x32xf32>
    %cst_19 = arith.constant dense<0.000000e+00> : vector<100x32xf32>
    %22 = tpu.matmul %20, %2, %cst_19 {dimension_numbers = #tpu.dot_dimension_numbers<[1], [0], [0], [1], [0, 0, 1, 1], [], []>} : vector<100x32xf32>, vector<32x32xf32>, vector<100x32xf32> -> vector<100x32xf32>
    %cst_20 = arith.constant dense<0.000000e+00> : vector<100x32xf32>
    %23 = tpu.matmul %20, %3, %cst_20 {dimension_numbers = #tpu.dot_dimension_numbers<[1], [0], [0], [1], [0, 0, 1, 1], [], []>} : vector<100x32xf32>, vector<32x32xf32>, vector<100x32xf32> -> vector<100x32xf32>
    %cst_21 = arith.constant dense<0.000000e+00> : vector<100x100xf32>
    %24 = tpu.matmul %21, %22, %cst_21 {dimension_numbers = #tpu.dot_dimension_numbers<[1], [1], [0], [0], [0, 0, 1, 0], [], []>} : vector<100x32xf32>, vector<100x32xf32>, vector<100x100xf32> -> vector<100x100xf32>
    %cst_22 = arith.constant dense<0xFF800000> : vector<100xf32>
    %25 = vector.multi_reduction <maximumf>, %24, %cst_22 [1] : vector<100x100xf32> to vector<100xf32>
    %26 = vector.shape_cast %25 : vector<100xf32> to vector<100x1xf32>
    %27 = vector.broadcast %26 : vector<100x1xf32> to vector<100x100xf32>
    %28 = arith.subf %24, %27 : vector<100x100xf32>
    %29 = math.exp %28 : vector<100x100xf32>
    %cst_23 = arith.constant dense<0.000000e+00> : vector<100xf32>
    %30 = vector.multi_reduction <add>, %29, %cst_23 [1] : vector<100x100xf32> to vector<100xf32>
    %31 = vector.shape_cast %30 : vector<100xf32> to vector<100x1xf32>
    %32 = tpu.reciprocal %31 {approx = true} : vector<100x1xf32> -> vector<100x1xf32>
    %33 = vector.broadcast %32 : vector<100x1xf32> to vector<100x100xf32>
    %34 = arith.mulf %29, %33 : vector<100x100xf32>
    %cst_24 = arith.constant dense<0.000000e+00> : vector<100x32xf32>
    %35 = tpu.matmul %34, %23, %cst_24 {dimension_numbers = #tpu.dot_dimension_numbers<[1], [0], [0], [1], [0, 0, 1, 1], [], []>} : vector<100x100xf32>, vector<100x32xf32>, vector<100x32xf32> -> vector<100x32xf32>
    %cst_25 = arith.constant dense<0.000000e+00> : vector<100x32xf32>
    %36 = tpu.matmul %35, %4, %cst_25 {dimension_numbers = #tpu.dot_dimension_numbers<[1], [0], [0], [1], [0, 0, 1, 1], [], []>} : vector<100x32xf32>, vector<32x32xf32>, vector<100x32xf32> -> vector<100x32xf32>
    %37 = vector.broadcast %7 : vector<1x32xf32> to vector<100x32xf32>
    %38 = arith.addf %36, %37 : vector<100x32xf32>
    %39 = arith.addf %20, %38 : vector<100x32xf32>
    %cst_26 = arith.constant dense<0.000000e+00> : vector<100xf32>
    %40 = vector.multi_reduction <add>, %39, %cst_26 [1] : vector<100x32xf32> to vector<100xf32>
    %41 = vector.shape_cast %40 : vector<100xf32> to vector<100x1xf32>
    %cst_27 = arith.constant 3.200000e+01 : f32
    %42 = vector.broadcast %cst_27 : f32 to vector<100x1xf32>
    %43 = arith.divf %41, %42 : vector<100x1xf32>
    %44 = vector.broadcast %43 : vector<100x1xf32> to vector<100x32xf32>
    %45 = arith.subf %39, %44 : vector<100x32xf32>
    %46 = arith.mulf %45, %45 : vector<100x32xf32>
    %cst_28 = arith.constant dense<0.000000e+00> : vector<100xf32>
    %47 = vector.multi_reduction <add>, %46, %cst_28 [1] : vector<100x32xf32> to vector<100xf32>
    %48 = vector.shape_cast %47 : vector<100xf32> to vector<100x1xf32>
    %cst_29 = arith.constant 3.200000e+01 : f32
    %49 = vector.broadcast %cst_29 : f32 to vector<100x1xf32>
    %50 = arith.divf %48, %49 : vector<100x1xf32>
    %51 = vector.broadcast %43 : vector<100x1xf32> to vector<100x32xf32>
    %52 = arith.subf %39, %51 : vector<100x32xf32>
    %cst_30 = arith.constant 9.99999974E-6 : f32
    %53 = vector.broadcast %cst_30 : f32 to vector<100x1xf32>
    %54 = arith.addf %50, %53 : vector<100x1xf32>
    %55 = math.rsqrt %54 : vector<100x1xf32>
    %56 = vector.broadcast %55 : vector<100x1xf32> to vector<100x32xf32>
    %57 = arith.mulf %52, %56 : vector<100x32xf32>
    %58 = vector.broadcast %8 : vector<1x32xf32> to vector<100x32xf32>
    %59 = arith.mulf %57, %58 : vector<100x32xf32>
    %60 = vector.broadcast %9 : vector<1x32xf32> to vector<100x32xf32>
    %61 = arith.addf %59, %60 : vector<100x32xf32>
    %cst_31 = arith.constant dense<0.000000e+00> : vector<100x32xf32>
    %62 = tpu.matmul %61, %5, %cst_31 {dimension_numbers = #tpu.dot_dimension_numbers<[1], [0], [0], [1], [0, 0, 1, 1], [], []>} : vector<100x32xf32>, vector<32x32xf32>, vector<100x32xf32> -> vector<100x32xf32>
    %63 = vector.broadcast %10 : vector<1x32xf32> to vector<100x32xf32>
    %64 = arith.addf %62, %63 : vector<100x32xf32>
    %cst_32 = arith.constant 0.000000e+00 : f32
    %65 = vector.broadcast %cst_32 : f32 to vector<100x32xf32>
    %66 = arith.cmpf ogt, %64, %65 : vector<100x32xf32>
    %cst_33 = arith.constant 0.000000e+00 : f32
    %67 = vector.broadcast %cst_33 : f32 to vector<100x32xf32>
    %68 = arith.minimumf %64, %67 : vector<100x32xf32>
    %69 = math.exp %68 : vector<100x32xf32>
    %cst_34 = arith.constant 1.000000e+00 : f32
    %70 = vector.broadcast %cst_34 : f32 to vector<100x32xf32>
    %71 = arith.subf %69, %70 : vector<100x32xf32>
    %72 = arith.select %66, %64, %71 : vector<100x32xi1>, vector<100x32xf32>
    %cst_35 = arith.constant dense<0.000000e+00> : vector<100x32xf32>
    %73 = tpu.matmul %72, %5, %cst_35 {dimension_numbers = #tpu.dot_dimension_numbers<[1], [0], [0], [1], [0, 0, 1, 1], [], []>} : vector<100x32xf32>, vector<32x32xf32>, vector<100x32xf32> -> vector<100x32xf32>
    %74 = vector.broadcast %10 : vector<1x32xf32> to vector<100x32xf32>
    %75 = arith.addf %73, %74 : vector<100x32xf32>
    %76 = arith.addf %61, %75 : vector<100x32xf32>
    %cst_36 = arith.constant dense<0.000000e+00> : vector<100xf32>
    %77 = vector.multi_reduction <add>, %76, %cst_36 [1] : vector<100x32xf32> to vector<100xf32>
    %78 = vector.shape_cast %77 : vector<100xf32> to vector<100x1xf32>
    %cst_37 = arith.constant 3.200000e+01 : f32
    %79 = vector.broadcast %cst_37 : f32 to vector<100x1xf32>
    %80 = arith.divf %78, %79 : vector<100x1xf32>
    %81 = vector.broadcast %80 : vector<100x1xf32> to vector<100x32xf32>
    %82 = arith.subf %76, %81 : vector<100x32xf32>
    %83 = arith.mulf %82, %82 : vector<100x32xf32>
    %cst_38 = arith.constant dense<0.000000e+00> : vector<100xf32>
    %84 = vector.multi_reduction <add>, %83, %cst_38 [1] : vector<100x32xf32> to vector<100xf32>
    %85 = vector.shape_cast %84 : vector<100xf32> to vector<100x1xf32>
    %cst_39 = arith.constant 3.200000e+01 : f32
    %86 = vector.broadcast %cst_39 : f32 to vector<100x1xf32>
    %87 = arith.divf %85, %86 : vector<100x1xf32>
    %88 = vector.broadcast %80 : vector<100x1xf32> to vector<100x32xf32>
    %89 = arith.subf %76, %88 : vector<100x32xf32>
    %cst_40 = arith.constant 9.99999974E-6 : f32
    %90 = vector.broadcast %cst_40 : f32 to vector<100x1xf32>
    %91 = arith.addf %87, %90 : vector<100x1xf32>
    %92 = math.rsqrt %91 : vector<100x1xf32>
    %93 = vector.broadcast %92 : vector<100x1xf32> to vector<100x32xf32>
    %94 = arith.mulf %89, %93 : vector<100x32xf32>
    %95 = vector.broadcast %11 : vector<1x32xf32> to vector<100x32xf32>
    %96 = arith.mulf %94, %95 : vector<100x32xf32>
    %97 = vector.broadcast %12 : vector<1x32xf32> to vector<100x32xf32>
    %98 = arith.addf %96, %97 : vector<100x32xf32>
    %99 = arith.mulf %98, %13 : vector<100x32xf32>
    %cst_41 = arith.constant dense<0.000000e+00> : vector<100xf32>
    %100 = vector.multi_reduction <add>, %99, %cst_41 [1] : vector<100x32xf32> to vector<100xf32>
    %101 = vector.shape_cast %100 : vector<100xf32> to vector<100x1xf32>
    %102 = tpu.iota {dimensions = array<i32: 0>} : vector<1x100xi32>
    %c0_i32 = arith.constant 0 : i32
    %103 = vector.broadcast %c0_i32 : i32 to vector<1x100xi32>
    %104 = arith.cmpi eq, %103, %102 : vector<1x100xi32>
    %105 = arith.extui %104 : vector<1x100xi1> to vector<1x100xi32>
    %106 = arith.sitofp %105 : vector<1x100xi32> to vector<1x100xf32>
    %cst_42 = arith.constant dense<0.000000e+00> : vector<1x1xf32>
    %107 = tpu.matmul %106, %101, %cst_42 {dimension_numbers = #tpu.dot_dimension_numbers<[1], [0], [0], [1], [0, 0, 1, 1], [], []>} : vector<1x100xf32>, vector<100x1xf32>, vector<1x1xf32> -> vector<1x1xf32>
    %c0_43 = arith.constant 0 : index
    %c0_44 = arith.constant 0 : index
    %c0_45 = arith.constant 0 : index
    %108 = vector.load %arg3[%c0_43, %c0_44, %c0_45] : memref<1x1x1xf32, #tpu.memory_space<vmem>>, vector<1x1x1xf32>
    %109 = vector.shape_cast %108 : vector<1x1x1xf32> to vector<1x1xf32>
    %110 = vector.shape_cast %107 : vector<1x1xf32> to vector<1x1x1xf32>
    tpu.vector_store %arg3[%c0_43, %c0_44, %c0_45], %110 {strides = array<i32>} : memref<1x1x1xf32, #tpu.memory_space<vmem>>, vector<1x1x1xf32>,
    return
  }
  func.func @transform_0(%arg0: i32) -> (i32, i32, i32) {
    %c0_i32 = arith.constant 0 : i32
    %c0_i32_0 = arith.constant 0 : i32
    %c0_i32_1 = arith.constant 0 : i32
    return %arg0, %c0_i32, %c0_i32_0 : i32, i32, i32
  }
  func.func @transform_1(%arg0: i32) -> (i32, i32) {
    %c0_i32 = arith.constant 0 : i32
    %c0_i32_0 = arith.constant 0 : i32
    %c0_i32_1 = arith.constant 0 : i32
    return %c0_i32, %c0_i32_0 : i32, i32
  }
  func.func @transform_2(%arg0: i32) -> (i32, i32, i32) {
    %c0_i32 = arith.constant 0 : i32
    %c0_i32_0 = arith.constant 0 : i32
    %c0_i32_1 = arith.constant 0 : i32
    return %arg0, %c0_i32, %c0_i32_0 : i32, i32, i32
  }
}

</mosaic_0001>

<bundles_post_ra>
// kernel: forward.1
= control target key start
LH: loop header
LB: loop body
LE: loop exit
PB: predicated region body
PF: predicated region fallthrough
CT: control target
= control target key end

     0   :  { %s3670_s9 = smov 0   ;;  %s4988_s0 = inlined_call_operand.vmem [shape: f32[2,100,32], index: 0, kind: input, shape index: {}]   ;;  %s4989_s1 = inlined_call_operand.vmem [shape: f32[408,32], index: 1, kind: input, shape index: {}]   ;;  %s4990_s2 = inlined_call_operand.vmem [shape: f32[2,1,1], index: 2, kind: output, shape index: {}]  }
   0x1 LB: > { %s2561_s10 = sadd.s32 4294967295, %s3650_s9   ;;  %p2565_p0 = scmp.ge.s32.totalorder %s3650_s9, 1  ;;  %s3650_s9 = sphi %s3670_s9, %s12_s9  }
   0x2   : > { %p112_p1 = scmp.lt.s32.totalorder %s3650_s9, 3 }
   0x4   : > { %p113_p2 = pnand %p2565_p0, %p112_p1 }
   0x5   : > { %v140_v0 = vld [vmem:[%s4989_s1] sm:$0xff] (!%p113_p2)  ;;  %v141_v1 = vld [vmem:[%s4989_s1 + $0x8] sm:$0xff] (!%p113_p2)  ;;  %v142_v2 = vld [vmem:[%s4989_s1 + $0x10] sm:$0xff] (!%p113_p2)  ;;  %v3652_v3 = vmov (!%p113_p2), 0.0|0.0   ;;  %vm3653_vm0 = vmmov (!%p113_p2), 0   ;;  %v3654_v6 = vmov (!%p113_p2), 0.0  }
   0x6   : > { %116 = sbr.rel (%p113_p2) target bundleno = 2940 (0xb7c), region = 28  ;;  %3396 = vmatprep.subr.bf16.mxu0 (!%p113_p2), %v3652_v3  ;;  %v3397_v4 = vpack.c.bf16 (!%p113_p2), %v141_v1, %v140_v0  ;;  %v143_v5 = vld [vmem:[%s4989_s1 + $0x18] sm:$0xff] (!%p113_p2)  ;;  %2916 = vmatprep.mubr.msk.f32.mxu0 (!%p113_p2), %vm3653_vm0, %v3654_v6  ;;  %p132_p3 = scmp.lt.s32.totalorder (!%p113_p2), %s2561_s10, 1  ;;  %v148_v8 = vld [vmem:[%s4989_s1 + $0x40] sm:$0xff] (!%p113_p2)  ;;  %v149_v9 = vld [vmem:[%s4989_s1 + $0x48] sm:$0xff] (!%p113_p2)  ;;  %vm214_vm1 = vcmask (!%p113_p2), 261120  }
   0x7   : > { %3498 = vmatprep.subr.bf16.mxu1 (!%p113_p2), %v3652_v3  ;;  %2937 = vmatprep.mubr.msk.f32.mxu1 (!%p113_p2), %vm3653_vm0, %v3654_v6  ;;  %v3400_v7 = vpack.c.bf16 (!%p113_p2), %v143_v5, %v142_v2  ;;  %v144_v10 = vld [vmem:[%s4989_s1 + $0x20] sm:$0xff] (!%p113_p2)  ;;  %v145_v11 = vld [vmem:[%s4989_s1 + $0x28] sm:$0xff] (!%p113_p2)  ;;  %v3409_v13 = vpack.c.bf16 (!%p113_p2), %v149_v9, %v148_v8  ;;  %v150_v27 = vld [vmem:[%s4989_s1 + $0x50] sm:$0xff] (!%p113_p2)  ;;  %vm1218_vm3 = vcmask (!%p113_p2), 1043456   ;;  %vm1034_vm4 = vcmask (!%p113_p2), 818176  }
   0x8   : > { %3398 = vmatpush3.bf16.msra.mxu0 (!%p113_p2), %v3397_v4  ;;  %3500 = vmatpush3.bf16.msra.mxu1 (!%p113_p2), %v3397_v4  ;;  %v3403_v14 = vpack.c.bf16 (!%p113_p2), %v145_v11, %v144_v10  ;;  %v151_v28 = vld [vmem:[%s4989_s1 + $0x58] sm:$0xff] (!%p113_p2)  ;;  %v146_v29 = vld [vmem:[%s4989_s1 + $0x30] sm:$0xff] (!%p113_p2)  ;;  %v3791_v33 = vld [vmem:[%s4989_s1 + $0xc0] ss:$0 sm:$0xff] (!%p113_p2)  ;;  %vm1071_vm5 = vcmask (!%p113_p2), 814080   ;;  %vm1574_vm6 = vcmask (!%p113_p2), 257024  }
   0x9   : > { %3399 = vmatprep.subr.bf16.mxu0 (!%p113_p2), %v3652_v3  ;;  %3499 = vmatprep.subr.bf16.mxu1 (!%p113_p2), %v3652_v3  ;;  %v3412_v30 = vpack.c.bf16 (!%p113_p2), %v151_v28, %v150_v27  ;;  %v147_v31 = vld [vmem:[%s4989_s1 + $0x38] sm:$0xff] (!%p113_p2)  ;;  %v184_v34 = vld [vmem:[%s4989_s1 + $0x130] sm:$0xff] (!%p113_p2)  ;;  %v152_v36 = vld [vmem:[%s4989_s1 + $0x60] sm:$0xff] (!%p113_p2) }
   0xa   : > { %v3406_v32 = vpack.c.bf16 (!%p113_p2), %v147_v31, %v146_v29  ;;  %v153_v37 = vld [vmem:[%s4989_s1 + $0x68] sm:$0xff] (!%p113_p2)  ;;  %v185_v44 = vld [vmem:[%s4989_s1 + $0x138] sm:$0xff] (!%p113_p2)  ;;  %v154_v46 = vld [vmem:[%s4989_s1 + $0x70] sm:$0xff] (!%p113_p2) }
   0xb   : > { %v3415_v43 = vpack.c.bf16 (!%p113_p2), %v153_v37, %v152_v36  ;;  %v155_v47 = vld [vmem:[%s4989_s1 + $0x78] sm:$0xff] (!%p113_p2)  ;;  %v186_v54 = vld [vmem:[%s4989_s1 + $0x140] sm:$0xff] (!%p113_p2)  ;;  %v187_v61 = vld [vmem:[%s4989_s1 + $0x148] sm:$0xff] (!%p113_p2) }
   0xc   : > { %3401 = vmatpush3.bf16.msra.mxu0 (!%p113_p2), %v3400_v7  ;;  %3501 = vmatpush3.bf16.msra.mxu1 (!%p113_p2), %v3400_v7  ;;  %v3418_v53 = vpack.c.bf16 (!%p113_p2), %v155_v47, %v154_v46  ;;  %v188_v5 = vld [vmem:[%s4989_s1 + $0x150] sm:$0xff] (!%p113_p2)  ;;  %v194_v36 = vld [vmem:[%s4989_s1 + $0x180] sm:$0xff] (!%p113_p2)  ;;  %vm4053_vm2 = vmpackc.low (!%p113_p2), %vm214_vm1, %vm214_vm1 }
   0xd   : > { %s4994_s10 = smov (!%p132_p3, %s2561_s10), 1  ;;  %3408 = vmatprep.subr.bf16.mxu0 %v3652_v3  ;;  %3402 = vmatprep.subr.bf16.mxu1 %v3652_v3  ;;  %v192_v29 = vld [vmem:[%s4989_s1 + $0x170] sm:$0xff] }
   0xe   : > { %s3502_s19 = smul.u32 104, %s4994_s10  ;;  %s139_s27 = scalar_lea.vmem %s4990_s2, %s4994_s10 }
  0x10   : > { %s3716_s30 = scalar_lea.vmem %s4988_s0, %s3502_s19 }
  0x11   : > { %v197_v12 = vld [vmem:[%s3716_s30] sm:$0xff]  ;;  %v204_v15 = vld [vmem:[%s3716_s30 + $0x38] sm:$0xff]  ;;  %v198_v16 = vld [vmem:[%s3716_s30 + $0x8] sm:$0xff] }
  0x12   : > { %2917 = vmatmul.mubr.msk.f32.vlgmr.msra.gmra.mrb[0].mxu0 %vm214_vm1, %v197_v12  ;;  %2938 = vmatmul.mubr.msk.f32.vlgmr.msra.gmra.mrb[0].mxu1 %vm214_vm1, %v204_v15  ;;  %v205_v17 = vld [vmem:[%s3716_s30 + $0x40] sm:$0xff]  ;;  %v199_v18 = vld [vmem:[%s3716_s30 + $0x10] sm:$0xff]  ;;  %v206_v19 = vld [vmem:[%s3716_s30 + $0x48] sm:$0xff] }
  0x13   : > { %2919 = vmatprep.mubr.msk.f32.mxu0 %vm3653_vm0, %v3654_v6  ;;  %2940 = vmatprep.mubr.msk.f32.mxu1 %vm3653_vm0, %v3654_v6  ;;  %v200_v20 = vld [vmem:[%s3716_s30 + $0x18] sm:$0xff]  ;;  %v207_v21 = vld [vmem:[%s3716_s30 + $0x50] sm:$0xff]  ;;  %v201_v22 = vld [vmem:[%s3716_s30 + $0x20] sm:$0xff] }
  0x14   : > { %3410 = vmatpush3.bf16.msra.mxu0 %v3409_v13  ;;  %3404 = vmatpush3.bf16.msra.mxu1 %v3403_v14  ;;  %v208_v23 = vld [vmem:[%s3716_s30 + $0x58] sm:$0xff]  ;;  %v202_v24 = vld [vmem:[%s3716_s30 + $0x28] sm:$0xff]  ;;  %v209_v25 = vld [vmem:[%s3716_s30 + $0x60] sm:$0xf] }
  0x15   : > { %3411 = vmatprep.subr.bf16.mxu0 %v3652_v3  ;;  %3405 = vmatprep.subr.bf16.mxu1 %v3652_v3  ;;  %v203_v26 = vld [vmem:[%s3716_s30 + $0x30] sm:$0xff]  ;;  %v189_v13 = vld [vmem:[%s4989_s1 + $0x158] sm:$0xff] }
  0x16   : > { %2920 = vmatmul.mubr.msk.f32.gmra.mrb[2].mxu0 %vm214_vm1, %v198_v16  ;;  %2941 = vmatmul.mubr.msk.f32.gmra.mrb[2].mxu1 %vm214_vm1, %v205_v17 }
  0x17   : > { %2922 = vmatprep.mubr.msk.f32.mxu0 %vm3653_vm0, %v3654_v6  ;;  %2943 = vmatprep.mubr.msk.f32.mxu1 %vm3653_vm0, %v3654_v6 }
  0x18   : > { %3413 = vmatpush3.bf16.msra.mxu0 %v3412_v30  ;;  %3407 = vmatpush3.bf16.msra.mxu1 %v3406_v32  ;;  %v193_v32 = vld [vmem:[%s4989_s1 + $0x178] sm:$0xff] }
  0x19   : > { %3420 = vmatprep.subr.bf16.mxu0 %v3652_v3  ;;  %3414 = vmatprep.subr.bf16.mxu1 %v3652_v3 }
  0x1a   : > { %2923 = vmatmul.mubr.msk.f32.gmra.mrb[4].mxu0 %vm214_vm1, %v199_v18  ;;  %2944 = vmatmul.mubr.msk.f32.gmra.mrb[4].mxu1 %vm214_vm1, %v206_v19 }
  0x1b   : > { %2925 = vmatprep.mubr.msk.f32.mxu0 %vm3653_vm0, %v3654_v6  ;;  %2946 = vmatprep.mubr.msk.f32.mxu1 %vm3653_vm0, %v3654_v6 }
  0x1e   : > { %2926 = vmatmul.mubr.msk.f32.gmra.mrb[6].mxu0 %vm214_vm1, %v200_v20  ;;  %2947 = vmatmul.mubr.msk.f32.gmra.mrb[6].mxu1 %vm214_vm1, %v207_v21  ;;  %v190_v20 = vld [vmem:[%s4989_s1 + $0x160] sm:$0xff] }
  0x1f   : > { %2928 = vmatprep.mubr.msk.f32.mxu0 %vm3653_vm0, %v3654_v6  ;;  %2949 = vmatprep.mubr.msk.f32.mxu1 %vm3653_vm0, %v3654_v6 }
  0x22   : > { %2929 = vmatmul.mubr.msk.f32.gmra.mrb[8].mxu0 %vm214_vm1, %v201_v22  ;;  %2950 = vmatmul.mubr.msk.f32.gmra.mrb[8].mxu1 %vm214_vm1, %v208_v23 }
  0x23   : > { %2931 = vmatprep.mubr.msk.f32.mxu0 %vm3653_vm0, %v3654_v6  ;;  %2952 = vmatprep.mubr.msk.f32.mxu1 %vm3653_vm0, %v3654_v6 }
  0x26   : > { %2932 = vmatmul.mubr.msk.f32.gmra.mrb[10].mxu0 %vm214_vm1, %v202_v24  ;;  %2953 = vmatmul.mubr.msk.f32.gmra.mrb[10].mxu1 %vm214_vm1, %v209_v25  ;;  %v191_v25 = vld [vmem:[%s4989_s1 + $0x168] sm:$0xff] }
  0x27   : > { %2934 = vmatprep.mubr.msk.f32.mxu0 %vm3653_vm0, %v3654_v6  ;;  %2963 = vmatprep.mubr.msk.f32.mxu1 %vm3653_vm0, %v3654_v6 }
  0x2a   : > { %2935 = vmatmul.mubr.msk.f32.gmra.mrb[12].mxu0 %vm214_vm1, %v203_v26 }
  0x2b   : > { %3010 = vmatprep.mubr.msk.f32.mxu0 %vm3653_vm0, %v3654_v6 }
  0xe5   : > { %v320_v35 = vpop.f32.mrb[0].mxu0  ;;  %v3803_v40 = vpop.f32.mrb[0].mxu1 }
  0xe6   : > { %v321_v38 = vadd.f32 %v3791_v33, %v320_v35  ;;  %v2918_v39 = vpop.f32.mrb[1].mxu0  ;;  %v2939_v41 = vpop.f32.mrb[1].mxu1  ;;  %v356_v24 = vadd.f32 %v3791_v33, %v3803_v40 }
  0xe7   : > { %v195_v39 = vld [vmem:[%s4989_s1 + $0x188] sm:$0xff] }
  0xe8   : > { %v3805_v42 = vadd.f32 %v321_v38, %v184_v34  ;;  %v3906_v27 = vadd.f32 %v356_v24, %v191_v25 }
  0xe9   : > { %v325_v45 = vpop.f32.mrb[2].mxu0  ;;  %v3821_v50 = vpop.f32.mrb[2].mxu1 }
  0xea   : > { %v326_v48 = vadd.f32 %v3791_v33, %v325_v45  ;;  %v2921_v49 = vpop.f32.mrb[3].mxu0  ;;  %2964 = vmatmul.mubr.msk.f32.vlgmr.msra.gmra.mrb[12].mxu1 %vm214_vm1, %v3805_v42  ;;  %3011 = vmatmul.mubr.msk.f32.vlgmr.msra.gmra.mrb[14].mxu0 %vm214_vm1, %v3805_v42  ;;  %v2942_v51 = vpop.f32.mrb[3].mxu1  ;;  %v361_v28 = vadd.f32 %v3791_v33, %v3821_v50 }
  0xeb   : > { %2966 = vmatprep.mubr.msk.f32.mxu1 %vm3653_vm0, %v3654_v6  ;;  %3013 = vmatprep.mubr.msk.f32.mxu0 %vm3653_vm0, %v3654_v6 }
  0xec   : > { %v3827_v52 = vadd.f32 %v326_v48, %v185_v44  ;;  %3416 = vmatpush3.bf16.msra.mxu1 %v3415_v43  ;;  %v3921_v30 = vadd.f32 %v361_v28, %v192_v29  ;;  %v196_v43 = vld [vmem:[%s4989_s1 + $0x190] sm:$0xf] }
  0xed   : > { %v330_v55 = vpop.f32.mrb[4].mxu0  ;;  %3417 = vmatprep.subr.bf16.mxu1 %v3652_v3  ;;  %v365_v58 = vpop.f32.mrb[4].mxu1 }
  0xee   : > { %v331_v56 = vadd.f32 %v3791_v33, %v330_v55  ;;  %v2924_v57 = vpop.f32.mrb[5].mxu0  ;;  %2967 = vmatmul.mubr.msk.f32.gmra.mrb[14].mxu1 %vm214_vm1, %v3827_v52  ;;  %3014 = vmatmul.mubr.msk.f32.gmra.mrb[16].mxu0 %vm214_vm1, %v3827_v52  ;;  %v2945_v59 = vpop.f32.mrb[5].mxu1  ;;  %v366_v31 = vadd.f32 %v3791_v33, %v365_v58 }
  0xef   : > { %2969 = vmatprep.mubr.msk.f32.mxu1 %vm3653_vm0, %v3654_v6  ;;  %3016 = vmatprep.mubr.msk.f32.mxu0 %vm3653_vm0, %v3654_v6 }
  0xf0   : > { %v3842_v60 = vadd.f32 %v331_v56, %v186_v54  ;;  %3419 = vmatpush3.bf16.msra.mxu1 %v3418_v53  ;;  %v3935_v34 = vadd.f32 %v366_v31, %v193_v32 }
  0xf1   : > { %v335_v62 = vpop.f32.mrb[6].mxu0  ;;  %3444 = vmatprep.subr.bf16.mxu1 %v3652_v3  ;;  %v370_v1 = vpop.f32.mrb[6].mxu1 }
  0xf2   : > { %v336_v63 = vadd.f32 %v3791_v33, %v335_v62  ;;  %v2927_v0 = vpop.f32.mrb[7].mxu0  ;;  %2970 = vmatmul.mubr.msk.f32.gmra.mrb[16].mxu1 %vm214_vm1, %v3842_v60  ;;  %3017 = vmatmul.mubr.msk.f32.gmra.mrb[18].mxu0 %vm214_vm1, %v3842_v60  ;;  %v2948_v2 = vpop.f32.mrb[7].mxu1  ;;  %v371_v35 = vadd.f32 %v3791_v33, %v370_v1 }
  0xf3   : > { %2972 = vmatprep.mubr.msk.f32.mxu1 %vm3653_vm0, %v3654_v6  ;;  %3019 = vmatprep.mubr.msk.f32.mxu0 %vm3653_vm0, %v3654_v6 }
  0xf4   : > { %v3857_v4 = vadd.f32 %v336_v63, %v187_v61  ;;  %v3949_v37 = vadd.f32 %v371_v35, %v194_v36 }
  0xf5   : > { %v340_v7 = vpop.f32.mrb[8].mxu0  ;;  %v375_v10 = vpop.f32.mrb[8].mxu1 }
  0xf6   : > { %v341_v8 = vadd.f32 %v3791_v33, %v340_v7  ;;  %v2930_v9 = vpop.f32.mrb[9].mxu0  ;;  %2973 = vmatmul.mubr.msk.f32.gmra.mrb[18].mxu1 %vm214_vm1, %v3857_v4  ;;  %3020 = vmatmul.mubr.msk.f32.gmra.mrb[20].mxu0 %vm214_vm1, %v3857_v4  ;;  %v2951_v11 = vpop.f32.mrb[9].mxu1  ;;  %v376_v38 = vadd.f32 %v3791_v33, %v375_v10 }
  0xf7   : > { %2975 = vmatprep.mubr.msk.f32.mxu1 %vm3653_vm0, %v3654_v6  ;;  %3022 = vmatprep.mubr.msk.f32.mxu0 %vm3653_vm0, %v3654_v6 }
  0xf8   : > { %v3871_v12 = vadd.f32 %v341_v8, %v188_v5  ;;  %v3963_v40 = vadd.f32 %v376_v38, %v195_v39 }
  0xf9   : > { %v345_v14 = vpop.f32.mrb[10].mxu0  ;;  %v380_v17 = vpop.f32.mrb[10].mxu1 }
  0xfa   : > { %v346_v15 = vadd.f32 %v3791_v33, %v345_v14  ;;  %v2933_v16 = vpop.f32.mrb[11].mxu0  ;;  %2976 = vmatmul.mubr.msk.f32.gmra.mrb[20].mxu1 %vm214_vm1, %v3871_v12  ;;  %3023 = vmatmul.mubr.msk.f32.gmra.mrb[22].mxu0 %vm214_vm1, %v3871_v12  ;;  %v2954_v18 = vpop.f32.mrb[11].mxu1  ;;  %v381_v41 = vadd.f32 %v3791_v33, %v380_v17 }
  0xfb   : > { %2978 = vmatprep.mubr.msk.f32.mxu1 %vm3653_vm0, %v3654_v6  ;;  %3025 = vmatprep.mubr.msk.f32.mxu0 %vm3653_vm0, %v3654_v6 }
  0xfc   : > { %v3885_v19 = vadd.f32 %v346_v15, %v189_v13  ;;  %v3977_v44 = vadd.f32 %v381_v41, %v196_v43 }
  0xfd   : > { %v350_v21 = vpop.f32.mrb[12].mxu0 }
  0xfe   : > { %v351_v22 = vadd.f32 %v3791_v33, %v350_v21  ;;  %v2936_v23 = vpop.f32.mrb[13].mxu0  ;;  %2979 = vmatmul.mubr.msk.f32.gmra.mrb[22].mxu1 %vm214_vm1, %v3885_v19  ;;  %3026 = vmatmul.mubr.msk.f32.gmra.mrb[24].mxu0 %vm214_vm1, %v3885_v19 }
  0xff   : > { %2981 = vmatprep.mubr.msk.f32.mxu1 %vm3653_vm0, %v3654_v6  ;;  %3028 = vmatprep.mubr.msk.f32.mxu0 %vm3653_vm0, %v3654_v6 }
 0x100   : > { %v3904_v26 = vadd.f32 %v351_v22, %v190_v20 }
 0x102   : > { %2982 = vmatmul.mubr.msk.f32.gmra.mrb[24].mxu1 %vm214_vm1, %v3904_v26  ;;  %3029 = vmatmul.mubr.msk.f32.gmra.mrb[26].mxu0 %vm214_vm1, %v3904_v26 }
 0x103   : > { %2984 = vmatprep.mubr.msk.f32.mxu1 %vm3653_vm0, %v3654_v6  ;;  %3031 = vmatprep.mubr.msk.f32.mxu0 %vm3653_vm0, %v3654_v6 }
 0x106   : > { %2985 = vmatmul.mubr.msk.f32.gmra.mrb[26].mxu1 %vm214_vm1, %v3906_v27  ;;  %3032 = vmatmul.mubr.msk.f32.gmra.mrb[28].mxu0 %vm214_vm1, %v3906_v27 }
 0x107   : > { %2987 = vmatprep.mubr.msk.f32.mxu1 %vm3653_vm0, %v3654_v6  ;;  %3034 = vmatprep.mubr.msk.f32.mxu0 %vm3653_vm0, %v3654_v6 }
 0x10a   : > { %2988 = vmatmul.mubr.msk.f32.gmra.mrb[28].mxu1 %vm214_vm1, %v3921_v30  ;;  %3035 = vmatmul.mubr.msk.f32.gmra.mrb[30].mxu0 %vm214_vm1, %v3921_v30 }
 0x10b   : > { %2990 = vmatprep.mubr.msk.f32.mxu1 %vm3653_vm0, %v3654_v6  ;;  %3037 = vmatprep.mubr.msk.f32.mxu0 %vm3653_vm0, %v3654_v6 }
 0x10e   : > { %2991 = vmatmul.mubr.msk.f32.gmra.mrb[30].mxu1 %vm214_vm1, %v3935_v34  ;;  %3038 = vmatmul.mubr.msk.f32.gmra.mrb[32].mxu0 %vm214_vm1, %v3935_v34 }
 0x10f   : > { %2993 = vmatprep.mubr.msk.f32.mxu1 %vm3653_vm0, %v3654_v6  ;;  %3040 = vmatprep.mubr.msk.f32.mxu0 %vm3653_vm0, %v3654_v6 }
 0x112   : > { %2994 = vmatmul.mubr.msk.f32.gmra.mrb[32].mxu1 %vm214_vm1, %v3949_v37  ;;  %3041 = vmatmul.mubr.msk.f32.gmra.mrb[34].mxu0 %vm214_vm1, %v3949_v37 }
 0x113   : > { %2996 = vmatprep.mubr.msk.f32.mxu1 %vm3653_vm0, %v3654_v6  ;;  %3043 = vmatprep.mubr.msk.f32.mxu0 %vm3653_vm0, %v3654_v6 }
 0x116   : > { %2997 = vmatmul.mubr.msk.f32.gmra.mrb[34].mxu1 %vm214_vm1, %v3963_v40  ;;  %3044 = vmatmul.mubr.msk.f32.gmra.mrb[36].mxu0 %vm214_vm1, %v3963_v40 }
 0x117   : > { %2999 = vmatprep.mubr.msk.f32.mxu1 %vm3653_vm0, %v3654_v6  ;;  %3046 = vmatprep.mubr.msk.f32.mxu0 %vm3653_vm0, %v3654_v6 }
 0x11a   : > { %3000 = vmatmul.mubr.msk.f32.gmra.mrb[36].mxu1 %vm214_vm1, %v3977_v44  ;;  %3047 = vmatmul.mubr.msk.f32.gmra.mrb[38].mxu0 %vm214_vm1, %v3977_v44 }
 0x11b   : > { %3057 = vmatprep.mubr.msk.f32.mxu1 %vm3653_vm0, %v3654_v6  ;;  %3122 = vmatprep.mubr.msk.f32.mxu0 %vm3653_vm0, %v3654_v6 }
 0x11e   : > { %3058 = vmatmul.mubr.msk.f32.vlgmr.msra.gmra.mrb[38].mxu1 %vm214_vm1, %v3805_v42 }
 0x11f   : > { %3060 = vmatprep.mubr.msk.f32.mxu1 %vm3653_vm0, %v3654_v6 }
 0x122   : > { %3061 = vmatmul.mubr.msk.f32.gmra.mrb[40].mxu1 %vm214_vm1, %v3827_v52 }
 0x123   : > { %3063 = vmatprep.mubr.msk.f32.mxu1 %vm3653_vm0, %v3654_v6 }
 0x126   : > { %3064 = vmatmul.mubr.msk.f32.gmra.mrb[42].mxu1 %vm214_vm1, %v3842_v60 }
 0x127   : > { %3066 = vmatprep.mubr.msk.f32.mxu1 %vm3653_vm0, %v3654_v6 }
 0x12a   : > { %3067 = vmatmul.mubr.msk.f32.gmra.mrb[44].mxu1 %vm214_vm1, %v3857_v4 }
 0x12b   : > { %3069 = vmatprep.mubr.msk.f32.mxu1 %vm3653_vm0, %v3654_v6 }
 0x12e   : > { %3070 = vmatmul.mubr.msk.f32.gmra.mrb[46].mxu1 %vm214_vm1, %v3871_v12 }
 0x12f   : > { %3072 = vmatprep.mubr.msk.f32.mxu1 %vm3653_vm0, %v3654_v6 }
 0x132   : > { %3073 = vmatmul.mubr.msk.f32.gmra.mrb[48].mxu1 %vm214_vm1, %v3885_v19 }
 0x133   : > { %3075 = vmatprep.mubr.msk.f32.mxu1 %vm3653_vm0, %v3654_v6 }
 0x136   : > { %3076 = vmatmul.mubr.msk.f32.gmra.mrb[50].mxu1 %vm214_vm1, %v3904_v26 }
 0x137   : > { %3078 = vmatprep.mubr.msk.f32.mxu1 %vm3653_vm0, %v3654_v6 }
 0x13a   : > { %3079 = vmatmul.mubr.msk.f32.gmra.mrb[52].mxu1 %vm214_vm1, %v3906_v27 }
 0x13b   : > { %3081 = vmatprep.mubr.msk.f32.mxu1 %vm3653_vm0, %v3654_v6 }
 0x13e   : > { %3082 = vmatmul.mubr.msk.f32.gmra.mrb[54].mxu1 %vm214_vm1, %v3921_v30 }
 0x13f   : > { %3084 = vmatprep.mubr.msk.f32.mxu1 %vm3653_vm0, %v3654_v6 }
 0x142   : > { %3085 = vmatmul.mubr.msk.f32.gmra.mrb[56].mxu1 %vm214_vm1, %v3935_v34 }
 0x143   : > { %3087 = vmatprep.mubr.msk.f32.mxu1 %vm3653_vm0, %v3654_v6 }
 0x146   : > { %3088 = vmatmul.mubr.msk.f32.gmra.mrb[58].mxu1 %vm214_vm1, %v3949_v37 }
 0x147   : > { %3090 = vmatprep.mubr.msk.f32.mxu1 %vm3653_vm0, %v3654_v6 }
 0x14a   : > { %3091 = vmatmul.mubr.msk.f32.gmra.mrb[60].mxu1 %vm214_vm1, %v3963_v40 }
 0x14b   : > { %3093 = vmatprep.mubr.msk.f32.mxu1 %vm3653_vm0, %v3654_v6 }
 0x14e   : > { %3094 = vmatmul.mubr.msk.f32.gmra.mrb[62].mxu1 %vm214_vm1, %v3977_v44 }
 0x14f   : > { %3187 = vmatprep.mubr.msk.f32.mxu1 %vm3653_vm0, %v3654_v6 }
 0x1bd   : > { %v4047_v33 = vpop.f32.mrb[12].mxu1  ;;  %v632_v45 = vpop.f32.mrb[14].mxu0 }
 0x1be   : > { %v2965_v46 = vpop.f32.mrb[13].mxu1  ;;  %v3012_v47 = vpop.f32.mrb[15].mxu0 }
 0x1c1   : > { %v4049_v48 = vpop.f32.mrb[14].mxu1  ;;  %v637_v49 = vpop.f32.mrb[16].mxu0 }
 0x1c2   : > { %v3421_v51 = vpack.c.bf16 %v637_v49, %v632_v45  ;;  %v2968_v53 = vpop.f32.mrb[15].mxu1  ;;  %v3015_v54 = vpop.f32.mrb[17].mxu0 }
 0x1c4   : > { %3423 = vmatpush3.bf16.xpose.msk.msra.mxu0 %vm4053_vm2, %v3421_v51 }
 0x1c5   : > { %v4059_v55 = vpop.f32.mrb[16].mxu1  ;;  %v642_v56 = vpop.f32.mrb[18].mxu0  ;;  %3424 = vmatprep.subr.bf16.mxu0 %v3652_v3 }
 0x1c6   : > { %v2971_v57 = vpop.f32.mrb[17].mxu1  ;;  %v3018_v58 = vpop.f32.mrb[19].mxu0 }
 0x1c9   : > { %v4062_v59 = vpop.f32.mrb[18].mxu1  ;;  %v647_v61 = vpop.f32.mrb[20].mxu0 }
 0x1ca   : > { %v3425_v62 = vpack.c.bf16 %v647_v61, %v642_v56  ;;  %v2974_v63 = vpop.f32.mrb[19].mxu1  ;;  %v3021_v0 = vpop.f32.mrb[21].mxu0 }
 0x1cc   : > { %3427 = vmatpush3.bf16.xpose.msk.msra.mxu0 %vm4053_vm2, %v3425_v62 }
 0x1cd   : > { %v4066_v1 = vpop.f32.mrb[20].mxu1  ;;  %v652_v2 = vpop.f32.mrb[22].mxu0  ;;  %3428 = vmatprep.subr.bf16.mxu0 %v3652_v3 }
 0x1ce   : > { %v2977_v5 = vpop.f32.mrb[21].mxu1  ;;  %v3024_v7 = vpop.f32.mrb[23].mxu0 }
 0x1d1   : > { %v4069_v8 = vpop.f32.mrb[22].mxu1  ;;  %v657_v9 = vpop.f32.mrb[24].mxu0 }
 0x1d2   : > { %v3429_v10 = vpack.c.bf16 %v657_v9, %v652_v2  ;;  %v2980_v11 = vpop.f32.mrb[23].mxu1  ;;  %v3027_v13 = vpop.f32.mrb[25].mxu0 }
 0x1d4   : > { %3431 = vmatpush3.bf16.xpose.msk.msra.mxu0 %vm4053_vm2, %v3429_v10 }
 0x1d5   : > { %v4073_v14 = vpop.f32.mrb[24].mxu1  ;;  %v662_v15 = vpop.f32.mrb[26].mxu0  ;;  %3432 = vmatprep.subr.bf16.mxu0 %v3652_v3 }
 0x1d6   : > { %v2983_v16 = vpop.f32.mrb[25].mxu1  ;;  %v3030_v17 = vpop.f32.mrb[27].mxu0 }
 0x1d9   : > { %v4076_v18 = vpop.f32.mrb[26].mxu1  ;;  %v667_v20 = vpop.f32.mrb[28].mxu0 }
 0x1da   : > { %v3433_v21 = vpack.c.bf16 %v667_v20, %v662_v15  ;;  %v2986_v22 = vpop.f32.mrb[27].mxu1  ;;  %v3033_v23 = vpop.f32.mrb[29].mxu0 }
 0x1dc   : > { %3435 = vmatpush3.bf16.xpose.msk.msra.mxu0 %vm4053_vm2, %v3433_v21 }
 0x1dd   : > { %v4080_v24 = vpop.f32.mrb[28].mxu1  ;;  %v672_v25 = vpop.f32.mrb[30].mxu0  ;;  %3436 = vmatprep.subr.bf16.mxu0 %v3652_v3 }
 0x1de   : > { %v2989_v28 = vpop.f32.mrb[29].mxu1  ;;  %v3036_v29 = vpop.f32.mrb[31].mxu0 }
 0x1e1   : > { %v4083_v31 = vpop.f32.mrb[30].mxu1  ;;  %v677_v32 = vpop.f32.mrb[32].mxu0 }
 0x1e2   : > { %v3437_v35 = vpack.c.bf16 %v677_v32, %v672_v25  ;;  %v2992_v36 = vpop.f32.mrb[31].mxu1  ;;  %v3039_v38 = vpop.f32.mrb[33].mxu0 }
 0x1e4   : > { %3439 = vmatpush3.bf16.xpose.msk.msra.mxu0 %vm4053_vm2, %v3437_v35 }
 0x1e5   : > { %v4087_v39 = vpop.f32.mrb[32].mxu1  ;;  %v682_v41 = vpop.f32.mrb[34].mxu0  ;;  %3440 = vmatprep.subr.bf16.mxu0 %v3652_v3 }
 0x1e6   : > { %v2995_v43 = vpop.f32.mrb[33].mxu1  ;;  %v3042_v45 = vpop.f32.mrb[35].mxu0 }
 0x1e9   : > { %v4090_v46 = vpop.f32.mrb[34].mxu1  ;;  %v687_v47 = vpop.f32.mrb[36].mxu0 }
 0x1ea   : > { %v3441_v49 = vpack.c.bf16 %v687_v47, %v682_v41  ;;  %v2998_v51 = vpop.f32.mrb[35].mxu1  ;;  %v3045_v53 = vpop.f32.mrb[37].mxu0 }
 0x1ec   : > { %3443 = vmatpush3.bf16.xpose.msk.msra.mxu0 %vm4053_vm2, %v3441_v49 }
 0x1ed   : > { %v4094_v54 = vpop.f32.mrb[36].mxu1  ;;  %v692_v56 = vpop.f32.mrb[38].mxu0  ;;  %3120 = vmatprep.subr.mxu0 %v3654_v6 }
 0x1ee   : > { %v3001_v57 = vpop.f32.mrb[37].mxu1  ;;  %v3048_v58 = vpop.f32.mrb[39].mxu0 }
 0x1f1   : > { %v762_v61 = vpop.f32.mrb[38].mxu1 }
 0x1f2   : > { %v3059_v62 = vpop.f32.mrb[39].mxu1 }
 0x1f4   : > { %3121 = vmatpush3.xpose.msk.msra.mxu0 %vm214_vm1, %v692_v56 }
 0x1f5   : > { %v767_v63 = vpop.f32.mrb[40].mxu1  ;;  %3462 = vmatprep.subr.bf16.mxu0 %v3652_v3 }
 0x1f6   : > { %v3445_v0 = vpack.c.bf16 %v767_v63, %v762_v61  ;;  %v3062_v2 = vpop.f32.mrb[41].mxu1 }
 0x1f7   : > { %3123 = vmatmul.mubr.msk.f32.vlgmr.msra.gmra.mrb[40].mxu0 %vm214_vm1, %v4047_v33 }
 0x1f8   : > { %3446 = vmatpush3.bf16.msra.mxu1 %v3445_v0  ;;  %3125 = vmatprep.mubr.msk.f32.mxu0 %vm3653_vm0, %v3654_v6 }
 0x1f9   : > { %v772_v50 = vpop.f32.mrb[42].mxu1  ;;  %3447 = vmatprep.subr.bf16.mxu1 %v3652_v3 }
 0x1fa   : > { %v3065_v5 = vpop.f32.mrb[43].mxu1 }
 0x1fb   : > { %3126 = vmatmul.mubr.msk.f32.gmra.mrb[42].mxu0 %vm214_vm1, %v4049_v48 }
 0x1fc   : > { %3128 = vmatprep.mubr.msk.f32.mxu0 %vm3653_vm0, %v3654_v6 }
 0x1fd   : > { %v777_v7 = vpop.f32.mrb[44].mxu1 }
 0x1fe   : > { %v3448_v9 = vpack.c.bf16 %v777_v7, %v772_v50  ;;  %v3068_v10 = vpop.f32.mrb[45].mxu1 }
 0x1ff   : > { %3129 = vmatmul.mubr.msk.f32.gmra.mrb[44].mxu0 %vm214_vm1, %v4059_v55 }
 0x200   : > { %3449 = vmatpush3.bf16.msra.mxu1 %v3448_v9  ;;  %3131 = vmatprep.mubr.msk.f32.mxu0 %vm3653_vm0, %v3654_v6 }
 0x201   : > { %v782_v33 = vpop.f32.mrb[46].mxu1  ;;  %3450 = vmatprep.subr.bf16.mxu1 %v3652_v3 }
 0x202   : > { %v3071_v11 = vpop.f32.mrb[47].mxu1 }
 0x203   : > { %3132 = vmatmul.mubr.msk.f32.gmra.mrb[46].mxu0 %vm214_vm1, %v4062_v59 }
 0x204   : > { %3134 = vmatprep.mubr.msk.f32.mxu0 %vm3653_vm0, %v3654_v6 }
 0x205   : > { %v787_v48 = vpop.f32.mrb[48].mxu1 }
 0x206   : > { %v3451_v13 = vpack.c.bf16 %v787_v48, %v782_v33  ;;  %v3074_v15 = vpop.f32.mrb[49].mxu1 }
 0x207   : > { %3135 = vmatmul.mubr.msk.f32.gmra.mrb[48].mxu0 %vm214_vm1, %v4066_v1 }
 0x208   : > { %3452 = vmatpush3.bf16.msra.mxu1 %v3451_v13  ;;  %3137 = vmatprep.mubr.msk.f32.mxu0 %vm3653_vm0, %v3654_v6 }
 0x209   : > { %v792_v55 = vpop.f32.mrb[50].mxu1  ;;  %3453 = vmatprep.subr.bf16.mxu1 %v3652_v3 }
 0x20a   : > { %v3077_v16 = vpop.f32.mrb[51].mxu1 }
 0x20b   : > { %3138 = vmatmul.mubr.msk.f32.gmra.mrb[50].mxu0 %vm214_vm1, %v4069_v8 }
 0x20c   : > { %3140 = vmatprep.mubr.msk.f32.mxu0 %vm3653_vm0, %v3654_v6 }
 0x20d   : > { %v797_v59 = vpop.f32.mrb[52].mxu1 }
 0x20e   : > { %v3454_v17 = vpack.c.bf16 %v797_v59, %v792_v55  ;;  %v3080_v20 = vpop.f32.mrb[53].mxu1 }
 0x20f   : > { %3141 = vmatmul.mubr.msk.f32.gmra.mrb[52].mxu0 %vm214_vm1, %v4073_v14 }
 0x210   : > { %3455 = vmatpush3.bf16.msra.mxu1 %v3454_v17  ;;  %3143 = vmatprep.mubr.msk.f32.mxu0 %vm3653_vm0, %v3654_v6 }
 0x211   : > { %v802_v1 = vpop.f32.mrb[54].mxu1  ;;  %3456 = vmatprep.subr.bf16.mxu1 %v3652_v3 }
 0x212   : > { %v3083_v21 = vpop.f32.mrb[55].mxu1 }
 0x213   : > { %3144 = vmatmul.mubr.msk.f32.gmra.mrb[54].mxu0 %vm214_vm1, %v4076_v18 }
 0x214   : > { %3146 = vmatprep.mubr.msk.f32.mxu0 %vm3653_vm0, %v3654_v6 }
 0x215   : > { %v807_v8 = vpop.f32.mrb[56].mxu1 }
 0x216   : > { %v3457_v22 = vpack.c.bf16 %v807_v8, %v802_v1  ;;  %v3086_v23 = vpop.f32.mrb[57].mxu1 }
 0x217   : > { %3147 = vmatmul.mubr.msk.f32.gmra.mrb[56].mxu0 %vm214_vm1, %v4080_v24 }
 0x218   : > { %3458 = vmatpush3.bf16.msra.mxu1 %v3457_v22  ;;  %3149 = vmatprep.mubr.msk.f32.mxu0 %vm3653_vm0, %v3654_v6 }
 0x219   : > { %v812_v14 = vpop.f32.mrb[58].mxu1  ;;  %3459 = vmatprep.subr.bf16.mxu1 %v3652_v3 }
 0x21a   : > { %v3089_v25 = vpop.f32.mrb[59].mxu1 }
 0x21b   : > { %3150 = vmatmul.mubr.msk.f32.gmra.mrb[58].mxu0 %vm214_vm1, %v4083_v31 }
 0x21c   : > { %3152 = vmatprep.mubr.msk.f32.mxu0 %vm3653_vm0, %v3654_v6 }
 0x21d   : > { %v817_v18 = vpop.f32.mrb[60].mxu1 }
 0x21e   : > { %v3460_v28 = vpack.c.bf16 %v817_v18, %v812_v14  ;;  %v3092_v29 = vpop.f32.mrb[61].mxu1 }
 0x21f   : > { %3153 = vmatmul.mubr.msk.f32.gmra.mrb[60].mxu0 %vm214_vm1, %v4087_v39 }
 0x220   : > { %3461 = vmatpush3.bf16.msra.mxu1 %v3460_v28  ;;  %3155 = vmatprep.mubr.msk.f32.mxu0 %vm3653_vm0, %v3654_v6 }
 0x221   : > { %v822_v24 = vpop.f32.mrb[62].mxu1  ;;  %3185 = vmatprep.subr.mxu1 %v3654_v6 }
 0x222   : > { %v3095_v32 = vpop.f32.mrb[63].mxu1 }
 0x223   : > { %3156 = vmatmul.mubr.msk.f32.gmra.mrb[62].mxu0 %vm214_vm1, %v4090_v46 }
 0x224   : > { %3186 = vmatpush3.msk.msra.mxu1 %vm1218_vm3, %v822_v24  ;;  %3158 = vmatprep.mubr.msk.f32.mxu0 %vm3653_vm0, %v3654_v6 }
 0x225   : > { %3468 = vmatprep.subr.bf16.mxu1 %v3652_v3 }
 0x227   : > { %3159 = vmatmul.mubr.msk.f32.gmra.mrb[64].mxu0 %vm214_vm1, %v4094_v54 }
 0x228   : > { %3234 = vmatprep.mubr.msk.f32.mxu0 %vm3653_vm0, %v3654_v6 }
 0x2ca   : > { %v970_v31 = vpop.f32.mrb[40].mxu0 }
 0x2cb   : > { %v3124_v35 = vpop.f32.mrb[41].mxu0  ;;  %v1035_v36 = vsel %vm1034_vm4, %v970_v31, -inf }
 0x2cc   : > { %1036 = vmax.xlane.f32.xlu0 %v1035_v36 }
 0x2ce   : > { %v975_v38 = vpop.f32.mrb[42].mxu0 }
 0x2cf   : > { %v3127_v39 = vpop.f32.mrb[43].mxu0  ;;  %v1038_v41 = vsel %vm1034_vm4, %v975_v38, -inf }
 0x2d0   : > { %1039 = vmax.xlane.f32.xlu0 %v1038_v41 }
 0x2d2   : > { %v980_v43 = vpop.f32.mrb[44].mxu0 }
 0x2d3   : > { %v3130_v45 = vpop.f32.mrb[45].mxu0  ;;  %v1041_v46 = vsel %vm1034_vm4, %v980_v43, -inf }
 0x2d4   : > { %1042 = vmax.xlane.f32.xlu1 %v1041_v46 }
 0x2d6   : > { %v985_v47 = vpop.f32.mrb[46].mxu0 }
 0x2d7   : > { %v3133_v49 = vpop.f32.mrb[47].mxu0  ;;  %v1044_v51 = vsel %vm1034_vm4, %v985_v47, -inf }
 0x2d8   : > { %1045 = vmax.xlane.f32.xlu1 %v1044_v51 }
 0x2da   : > { %v990_v53 = vpop.f32.mrb[48].mxu0 }
 0x2db   : > { %v3136_v54 = vpop.f32.mrb[49].mxu0  ;;  %v1047_v56 = vsel %vm1034_vm4, %v990_v53, -inf }
 0x2dc   : > { %1048 = vmax.xlane.f32.xlu0 %v1047_v56 }
 0x2de   : > { %v995_v57 = vpop.f32.mrb[50].mxu0 }
 0x2df   : > { %v3139_v58 = vpop.f32.mrb[51].mxu0  ;;  %v1050_v61 = vsel %vm1034_vm4, %v995_v57, -inf }
 0x2e0   : > { %1051 = vmax.xlane.f32.xlu1 %v1050_v61 }
 0x2e2   : > { %v4165_v62 = vpop.f32.mrb[52].mxu0 }
 0x2e3   : > { %v3142_v63 = vpop.f32.mrb[53].mxu0  ;;  %v1053_v0 = vsel %vm1034_vm4, %v4165_v62, -inf }
 0x2e4   : > { %1054 = vmax.xlane.f32.xlu0 %v1053_v0 }
 0x2e6   : > { %v4169_v2 = vpop.f32.mrb[54].mxu0 }
 0x2e7   : > { %v3145_v50 = vpop.f32.mrb[55].mxu0  ;;  %v1056_v5 = vsel %vm1034_vm4, %v4169_v2, -inf }
 0x2e8   : > { %1057 = vmax.xlane.f32.xlu1 %v1056_v5 }
 0x2ea   : > { %v4173_v7 = vpop.f32.mrb[56].mxu0 }
 0x2eb   : > { %v3148_v9 = vpop.f32.mrb[57].mxu0  ;;  %v1059_v10 = vsel %vm1034_vm4, %v4173_v7, -inf }
 0x2ec   : > { %1060 = vmax.xlane.f32.xlu0 %v1059_v10 }
 0x2ee   : > { %v4177_v33 = vpop.f32.mrb[58].mxu0 }
 0x2ef   : > { %v3151_v11 = vpop.f32.mrb[59].mxu0  ;;  %v1062_v48 = vsel %vm1034_vm4, %v4177_v33, -inf }
 0x2f0   : > { %1063 = vmax.xlane.f32.xlu1 %v1062_v48 }
 0x2f2   : > { %v4181_v13 = vpop.f32.mrb[60].mxu0 }
 0x2f3   : > { %v3154_v15 = vpop.f32.mrb[61].mxu0  ;;  %v1065_v55 = vsel %vm1034_vm4, %v4181_v13, -inf }
 0x2f4   : > { %1066 = vmax.xlane.f32.xlu0 %v1065_v55 }
 0x2f6   : > { %v4185_v16 = vpop.f32.mrb[62].mxu0 }
 0x2f7   : > { %v3157_v59 = vpop.f32.mrb[63].mxu0  ;;  %v1068_v17 = vsel %vm1034_vm4, %v4185_v16, -inf }
 0x2f8   : > { %1069 = vmax.xlane.f32.xlu1 %v1068_v17 }
 0x2fa   : > { %v4189_v20 = vpop.f32.mrb[64].mxu0 }
 0x2fb   : > { %v3160_v1 = vpop.f32.mrb[65].mxu0  ;;  %v1072_v21 = vsel %vm1071_vm5, %v4189_v20, -inf }
 0x2fc   : > { %1073 = vmax.xlane.f32.xlu0 %v1072_v21 }
 0x359   : > { %v1037_v8 = vpop.xlane.xlu0 %1036 }
 0x35a   : > { %v1075_v22 = vsub.f32 %v970_v31, %v1037_v8 }
 0x35c   : > { %v1088_v23 = vmul.f32 1.442695, %v1075_v22 }
 0x35d   : > { %v1040_v14 = vpop.xlane.xlu0 %1039 }
 0x35e   : > { %3514 = vpow2.f32 %v1088_v23  ;;  %v1076_v25 = vsub.f32 %v975_v38, %v1040_v14 }
 0x360   : > { %v1090_v18 = vmul.f32 1.442695, %v1076_v25 }
 0x361   : > { %v1043_v28 = vpop.xlane.xlu1 %1042 }
 0x362   : > { %3516 = vpow2.f32 %v1090_v18  ;;  %v1077_v29 = vsub.f32 %v980_v43, %v1043_v28 }
 0x364   : > { %v1092_v24 = vmul.f32 1.442695, %v1077_v29 }
 0x365   : > { %v1046_v32 = vpop.xlane.xlu1 %1045 }
 0x366   : > { %3518 = vpow2.f32 %v1092_v24  ;;  %v1078_v35 = vsub.f32 %v985_v47, %v1046_v32 }
 0x368   : > { %v4193_v36 = vpop.eup %3514  ;;  %v1094_v39 = vmul.f32 1.442695, %v1078_v35 }
 0x369   : > { %v1049_v41 = vpop.xlane.xlu0 %1048  ;;  %v1114_v45 = vsel %vm1034_vm4, %v4193_v36, 0.0 }
 0x36a   : > { %3520 = vpow2.f32 %v1094_v39  ;;  %v1079_v31 = vsub.f32 %v990_v53, %v1049_v41  ;;  %1115 = vadd.xlane.f32.xlu1 %v1114_v45 }
 0x36c   : > { %v4197_v46 = vpop.eup %3516  ;;  %v1096_v38 = vmul.f32 1.442695, %v1079_v31 }
 0x36d   : > { %v1052_v49 = vpop.xlane.xlu1 %1051  ;;  %v1117_v43 = vsel %vm1034_vm4, %v4197_v46, 0.0 }
 0x36e   : > { %3522 = vpow2.f32 %v1096_v38  ;;  %v1080_v51 = vsub.f32 %v995_v57, %v1052_v49  ;;  %1118 = vadd.xlane.f32.xlu0 %v1117_v43  ;;  %v156_v49 = vld [vmem:[%s4989_s1 + $0x80] sm:$0xff]  ;;  %v157_v43 = vld [vmem:[%s4989_s1 + $0x88] sm:$0xff] }
 0x370   : > { %v4201_v47 = vpop.eup %3518  ;;  %v1098_v54 = vmul.f32 1.442695, %v1080_v51  ;;  %v158_v51 = vld [vmem:[%s4989_s1 + $0x90] sm:$0xff] }
 0x371   : > { %v1055_v56 = vpop.xlane.xlu0 %1054  ;;  %v1120_v58 = vsel %vm1034_vm4, %v4201_v47, 0.0 }
 0x372   : > { %3524 = vpow2.f32 %v1098_v54  ;;  %v1081_v53 = vsub.f32 %v4165_v62, %v1055_v56  ;;  %1121 = vadd.xlane.f32.xlu1 %v1120_v58  ;;  %v3463_v54 = vpack.c.bf16 %v157_v43, %v156_v49  ;;  %v159_v56 = vld [vmem:[%s4989_s1 + $0x98] sm:$0xff] }
 0x373   : > { %v3466_v58 = vpack.c.bf16 %v159_v56, %v158_v51 }
 0x374   : > { %v4206_v61 = vpop.eup %3520  ;;  %v1100_v63 = vmul.f32 1.442695, %v1081_v53  ;;  %3464 = vmatpush3.bf16.msra.mxu0 %v3463_v54 }
 0x375   : > { %v1058_v0 = vpop.xlane.xlu1 %1057  ;;  %v1123_v50 = vsel %vm1034_vm4, %v4206_v61, 0.0  ;;  %3465 = vmatprep.subr.bf16.mxu0 %v3652_v3 }
 0x376   : > { %3526 = vpow2.f32 %v1100_v63  ;;  %v1082_v57 = vsub.f32 %v4169_v2, %v1058_v0  ;;  %1124 = vadd.xlane.f32.xlu0 %v1123_v50 }
 0x378   : > { %v4211_v5 = vpop.eup %3522  ;;  %v1102_v9 = vmul.f32 1.442695, %v1082_v57  ;;  %3467 = vmatpush3.bf16.msra.mxu0 %v3466_v58 }
 0x379   : > { %v1061_v10 = vpop.xlane.xlu0 %1060  ;;  %v1126_v11 = vsel %vm1034_vm4, %v4211_v5, 0.0  ;;  %3474 = vmatprep.subr.bf16.mxu0 %v3652_v3 }
 0x37a   : > { %3528 = vpow2.f32 %v1102_v9  ;;  %v1083_v62 = vsub.f32 %v4173_v7, %v1061_v10  ;;  %1127 = vadd.xlane.f32.xlu1 %v1126_v11 }
 0x37c   : > { %v4216_v48 = vpop.eup %3524  ;;  %v1104_v15 = vmul.f32 1.442695, %v1083_v62 }
 0x37d   : > { %v1064_v55 = vpop.xlane.xlu1 %1063  ;;  %v1129_v59 = vsel %vm1034_vm4, %v4216_v48, 0.0 }
 0x37e   : > { %3530 = vpow2.f32 %v1104_v15  ;;  %v1084_v2 = vsub.f32 %v4177_v33, %v1064_v55  ;;  %1130 = vadd.xlane.f32.xlu0 %v1129_v59 }
 0x380   : > { %v4221_v17 = vpop.eup %3526  ;;  %v1106_v1 = vmul.f32 1.442695, %v1084_v2 }
 0x381   : > { %v1067_v21 = vpop.xlane.xlu0 %1066  ;;  %v1132_v8 = vsel %vm1034_vm4, %v4221_v17, 0.0 }
 0x382   : > { %3532 = vpow2.f32 %v1106_v1  ;;  %v1085_v7 = vsub.f32 %v4181_v13, %v1067_v21  ;;  %1133 = vadd.xlane.f32.xlu1 %v1132_v8 }
 0x384   : > { %v4226_v22 = vpop.eup %3528  ;;  %v1108_v23 = vmul.f32 1.442695, %v1085_v7 }
 0x385   : > { %v1070_v14 = vpop.xlane.xlu1 %1069  ;;  %v1135_v25 = vsel %vm1034_vm4, %v4226_v22, 0.0 }
 0x386   : > { %3534 = vpow2.f32 %v1108_v23  ;;  %v1086_v33 = vsub.f32 %v4185_v16, %v1070_v14  ;;  %1136 = vadd.xlane.f32.xlu0 %v1135_v25 }
 0x388   : > { %v4231_v18 = vpop.eup %3530  ;;  %v1110_v28 = vmul.f32 1.442695, %v1086_v33 }
 0x389   : > { %v1074_v29 = vpop.xlane.xlu0 %1073  ;;  %v1138_v24 = vsel %vm1034_vm4, %v4231_v18, 0.0 }
 0x38a   : > { %3536 = vpow2.f32 %v1110_v28  ;;  %v1087_v13 = vsub.f32 %v4189_v20, %v1074_v29  ;;  %1139 = vadd.xlane.f32.xlu1 %v1138_v24 }
 0x38c   : > { %v4236_v32 = vpop.eup %3532  ;;  %v1112_v35 = vmul.f32 1.442695, %v1087_v13 }
 0x38d   : > { %v1141_v39 = vsel %vm1034_vm4, %v4236_v32, 0.0 }
 0x38e   : > { %3538 = vpow2.f32 %v1112_v35  ;;  %1142 = vadd.xlane.f32.xlu0 %v1141_v39 }
 0x390   : > { %v4240_v16 = vpop.eup %3534 }
 0x391   : > { %v1144_v41 = vsel %vm1034_vm4, %v4240_v16, 0.0 }
 0x392   : > { %1145 = vadd.xlane.f32.xlu1 %v1144_v41 }
 0x394   : > { %v4244_v45 = vpop.eup %3536 }
 0x395   : > { %v1147_v20 = vsel %vm1034_vm4, %v4244_v45, 0.0 }
 0x396   : > { %1148 = vadd.xlane.f32.xlu0 %v1147_v20 }
 0x398   : > { %v4248_v31 = vpop.eup %3538 }
 0x399   : > { %v1150_v38 = vsel %vm1071_vm5, %v4248_v31, 0.0 }
 0x39a   : > { %1151 = vadd.xlane.f32.xlu1 %v1150_v38 }
 0x3f7   : > { %v1116_v53 = vpop.xlane.xlu1 %1115 }
 0x3f8   : > { %3540 = vrcp.f32 %v1116_v53 }
 0x3fb   : > { %v1119_v63 = vpop.xlane.xlu0 %1118 }
 0x3fc   : > { %3542 = vrcp.f32 %v1119_v63 }
 0x3ff   : > { %v1122_v0 = vpop.xlane.xlu1 %1121 }
 0x400   : > { %3544 = vrcp.f32 %v1122_v0 }
 0x402   : > { %v3541_v50 = vpop.eup %3540 }
 0x403   : > { %v1166_v57 = vmul.f32 %v3541_v50, %v4193_v36  ;;  %v1125_v9 = vpop.xlane.xlu0 %1124 }
 0x404   : > { %3546 = vrcp.f32 %v1125_v9 }
 0x405   : > { %3188 = vmatmul.mubr.msk.f32.vlgmr.msra.gmra.mrb[64].mxu1 %vm1034_vm4, %v1166_v57 }
 0x406   : > { %v3543_v10 = vpop.eup %3542  ;;  %3190 = vmatprep.mubr.msk.f32.mxu1 %vm3653_vm0, %v3654_v6 }
 0x407   : > { %v1128_v11 = vpop.xlane.xlu1 %1127  ;;  %v1167_v62 = vmul.f32 %v3543_v10, %v4197_v46 }
 0x408   : > { %3548 = vrcp.f32 %v1128_v11 }
 0x409   : > { %3191 = vmatmul.mubr.msk.f32.gmra.mrb[66].mxu1 %vm1034_vm4, %v1167_v62 }
 0x40a   : > { %v3545_v15 = vpop.eup %3544  ;;  %3193 = vmatprep.mubr.msk.f32.mxu1 %vm3653_vm0, %v3654_v6 }
 0x40b   : > { %v1131_v55 = vpop.xlane.xlu0 %1130  ;;  %v1168_v36 = vmul.f32 %v3545_v15, %v4201_v47 }
 0x40c   : > { %3550 = vrcp.f32 %v1131_v55 }
 0x40d   : > { %3194 = vmatmul.mubr.msk.f32.gmra.mrb[68].mxu1 %vm1034_vm4, %v1168_v36 }
 0x40e   : > { %v3547_v59 = vpop.eup %3546  ;;  %3196 = vmatprep.mubr.msk.f32.mxu1 %vm3653_vm0, %v3654_v6 }
 0x40f   : > { %v1134_v2 = vpop.xlane.xlu1 %1133  ;;  %v1169_v46 = vmul.f32 %v3547_v59, %v4206_v61 }
 0x410   : > { %3552 = vrcp.f32 %v1134_v2 }
 0x411   : > { %3197 = vmatmul.mubr.msk.f32.gmra.mrb[70].mxu1 %vm1034_vm4, %v1169_v46 }
 0x412   : > { %v3549_v1 = vpop.eup %3548  ;;  %3199 = vmatprep.mubr.msk.f32.mxu1 %vm3653_vm0, %v3654_v6 }
 0x413   : > { %v1137_v21 = vpop.xlane.xlu0 %1136  ;;  %v1170_v47 = vmul.f32 %v3549_v1, %v4211_v5 }
 0x414   : > { %3554 = vrcp.f32 %v1137_v21  ;;  %v4360_v21 = vld [vmem:[%s4989_s1 + $0xc1] ss:$0 sm:$0xff] }
 0x415   : > { %3200 = vmatmul.mubr.msk.f32.gmra.mrb[72].mxu1 %vm1034_vm4, %v1170_v47 }
 0x416   : > { %v3551_v8 = vpop.eup %3550  ;;  %3202 = vmatprep.mubr.msk.f32.mxu1 %vm3653_vm0, %v3654_v6 }
 0x417   : > { %v1140_v7 = vpop.xlane.xlu1 %1139  ;;  %v1171_v61 = vmul.f32 %v3551_v8, %v4216_v48 }
 0x418   : > { %3556 = vrcp.f32 %v1140_v7 }
 0x419   : > { %3203 = vmatmul.mubr.msk.f32.gmra.mrb[74].mxu1 %vm1034_vm4, %v1171_v61 }
 0x41a   : > { %v3553_v23 = vpop.eup %3552  ;;  %3205 = vmatprep.mubr.msk.f32.mxu1 %vm3653_vm0, %v3654_v6 }
 0x41b   : > { %v1143_v14 = vpop.xlane.xlu0 %1142  ;;  %v1172_v5 = vmul.f32 %v3553_v23, %v4221_v17 }
 0x41c   : > { %3558 = vrcp.f32 %v1143_v14 }
 0x41d   : > { %3206 = vmatmul.mubr.msk.f32.gmra.mrb[76].mxu1 %vm1034_vm4, %v1172_v5 }
 0x41e   : > { %v3555_v25 = vpop.eup %3554  ;;  %3208 = vmatprep.mubr.msk.f32.mxu1 %vm3653_vm0, %v3654_v6 }
 0x41f   : > { %v1146_v33 = vpop.xlane.xlu1 %1145  ;;  %v1173_v48 = vmul.f32 %v3555_v25, %v4226_v22 }
 0x420   : > { %3560 = vrcp.f32 %v1146_v33 }
 0x421   : > { %3209 = vmatmul.mubr.msk.f32.gmra.mrb[78].mxu1 %vm1034_vm4, %v1173_v48 }
 0x422   : > { %v3557_v28 = vpop.eup %3556  ;;  %3211 = vmatprep.mubr.msk.f32.mxu1 %vm3653_vm0, %v3654_v6 }
 0x423   : > { %v1149_v29 = vpop.xlane.xlu0 %1148  ;;  %v1174_v17 = vmul.f32 %v3557_v28, %v4231_v18 }
 0x424   : > { %3562 = vrcp.f32 %v1149_v29 }
 0x425   : > { %3212 = vmatmul.mubr.msk.f32.gmra.mrb[80].mxu1 %vm1034_vm4, %v1174_v17 }
 0x426   : > { %v3559_v24 = vpop.eup %3558  ;;  %3214 = vmatprep.mubr.msk.f32.mxu1 %vm3653_vm0, %v3654_v6 }
 0x427   : > { %v1152_v13 = vpop.xlane.xlu1 %1151  ;;  %v1175_v22 = vmul.f32 %v3559_v24, %v4236_v32 }
 0x428   : > { %3564 = vrcp.f32 %v1152_v13 }
 0x429   : > { %3215 = vmatmul.mubr.msk.f32.gmra.mrb[82].mxu1 %vm1034_vm4, %v1175_v22 }
 0x42a   : > { %v3561_v35 = vpop.eup %3560  ;;  %3217 = vmatprep.mubr.msk.f32.mxu1 %vm3653_vm0, %v3654_v6 }
 0x42b   : > { %v1176_v39 = vmul.f32 %v3561_v35, %v4240_v16 }
 0x42d   : > { %3218 = vmatmul.mubr.msk.f32.gmra.mrb[84].mxu1 %vm1034_vm4, %v1176_v39 }
 0x42e   : > { %v3563_v18 = vpop.eup %3562  ;;  %3220 = vmatprep.mubr.msk.f32.mxu1 %vm3653_vm0, %v3654_v6 }
 0x42f   : > { %v1177_v41 = vmul.f32 %v3563_v18, %v4244_v45 }
 0x431   : > { %3221 = vmatmul.mubr.msk.f32.gmra.mrb[86].mxu1 %vm1034_vm4, %v1177_v41 }
 0x432   : > { %v3565_v32 = vpop.eup %3564  ;;  %3223 = vmatprep.mubr.msk.f32.mxu1 %vm3653_vm0, %v3654_v6 }
 0x433   : > { %v1178_v20 = vmul.f32 %v3565_v32, %v4248_v31 }
 0x435   : > { %3224 = vmatmul.mubr.msk.f32.gmra.mrb[88].mxu1 %vm1034_vm4, %v1178_v20 }
 0x436   : > { %3281 = vmatprep.mubr.msk.f32.mxu1 %vm3653_vm0, %v3654_v6 }
 0x4d8   : > { %v1288_v16 = vpop.f32.mrb[64].mxu1 }
 0x4d9   : > { %v3189_v38 = vpop.f32.mrb[65].mxu1  ;;  %3235 = vmatmul.mubr.msk.f32.vlgmr.msra.gmra.mrb[66].mxu0 %vm214_vm1, %v1288_v16 }
 0x4da   : > { %3237 = vmatprep.mubr.msk.f32.mxu0 %vm3653_vm0, %v3654_v6 }
 0x4dc   : > { %v1293_v45 = vpop.f32.mrb[66].mxu1 }
 0x4dd   : > { %v3192_v49 = vpop.f32.mrb[67].mxu1  ;;  %3238 = vmatmul.mubr.msk.f32.gmra.mrb[68].mxu0 %vm214_vm1, %v1293_v45 }
 0x4de   : > { %3240 = vmatprep.mubr.msk.f32.mxu0 %vm3653_vm0, %v3654_v6 }
 0x4e0   : > { %v1298_v31 = vpop.f32.mrb[68].mxu1 }
 0x4e1   : > { %v3195_v43 = vpop.f32.mrb[69].mxu1  ;;  %3241 = vmatmul.mubr.msk.f32.gmra.mrb[70].mxu0 %vm214_vm1, %v1298_v31 }
 0x4e2   : > { %3243 = vmatprep.mubr.msk.f32.mxu0 %vm3653_vm0, %v3654_v6 }
 0x4e4   : > { %v1303_v51 = vpop.f32.mrb[70].mxu1 }
 0x4e5   : > { %v3198_v54 = vpop.f32.mrb[71].mxu1  ;;  %3244 = vmatmul.mubr.msk.f32.gmra.mrb[72].mxu0 %vm214_vm1, %v1303_v51 }
 0x4e6   : > { %3246 = vmatprep.mubr.msk.f32.mxu0 %vm3653_vm0, %v3654_v6 }
 0x4e8   : > { %v1308_v56 = vpop.f32.mrb[72].mxu1 }
 0x4e9   : > { %v3201_v58 = vpop.f32.mrb[73].mxu1  ;;  %3247 = vmatmul.mubr.msk.f32.gmra.mrb[74].mxu0 %vm214_vm1, %v1308_v56 }
 0x4ea   : > { %3249 = vmatprep.mubr.msk.f32.mxu0 %vm3653_vm0, %v3654_v6 }
 0x4ec   : > { %v1313_v53 = vpop.f32.mrb[74].mxu1 }
 0x4ed   : > { %v3204_v63 = vpop.f32.mrb[75].mxu1  ;;  %3250 = vmatmul.mubr.msk.f32.gmra.mrb[76].mxu0 %vm214_vm1, %v1313_v53 }
 0x4ee   : > { %3252 = vmatprep.mubr.msk.f32.mxu0 %vm3653_vm0, %v3654_v6 }
 0x4f0   : > { %v1318_v0 = vpop.f32.mrb[76].mxu1 }
 0x4f1   : > { %v3207_v50 = vpop.f32.mrb[77].mxu1  ;;  %3253 = vmatmul.mubr.msk.f32.gmra.mrb[78].mxu0 %vm214_vm1, %v1318_v0 }
 0x4f2   : > { %3255 = vmatprep.mubr.msk.f32.mxu0 %vm3653_vm0, %v3654_v6 }
 0x4f4   : > { %v1323_v57 = vpop.f32.mrb[78].mxu1 }
 0x4f5   : > { %v3210_v9 = vpop.f32.mrb[79].mxu1  ;;  %3256 = vmatmul.mubr.msk.f32.gmra.mrb[80].mxu0 %vm214_vm1, %v1323_v57 }
 0x4f6   : > { %3258 = vmatprep.mubr.msk.f32.mxu0 %vm3653_vm0, %v3654_v6 }
 0x4f8   : > { %v1328_v10 = vpop.f32.mrb[80].mxu1 }
 0x4f9   : > { %v3213_v11 = vpop.f32.mrb[81].mxu1  ;;  %3259 = vmatmul.mubr.msk.f32.gmra.mrb[82].mxu0 %vm214_vm1, %v1328_v10 }
 0x4fa   : > { %3261 = vmatprep.mubr.msk.f32.mxu0 %vm3653_vm0, %v3654_v6 }
 0x4fc   : > { %v1333_v62 = vpop.f32.mrb[82].mxu1 }
 0x4fd   : > { %v3216_v15 = vpop.f32.mrb[83].mxu1  ;;  %3262 = vmatmul.mubr.msk.f32.gmra.mrb[84].mxu0 %vm214_vm1, %v1333_v62 }
 0x4fe   : > { %3264 = vmatprep.mubr.msk.f32.mxu0 %vm3653_vm0, %v3654_v6 }
 0x500   : > { %v1338_v55 = vpop.f32.mrb[84].mxu1 }
 0x501   : > { %v3219_v36 = vpop.f32.mrb[85].mxu1  ;;  %3265 = vmatmul.mubr.msk.f32.gmra.mrb[86].mxu0 %vm214_vm1, %v1338_v55 }
 0x502   : > { %3267 = vmatprep.mubr.msk.f32.mxu0 %vm3653_vm0, %v3654_v6 }
 0x504   : > { %v1343_v59 = vpop.f32.mrb[86].mxu1 }
 0x505   : > { %v3222_v2 = vpop.f32.mrb[87].mxu1  ;;  %3268 = vmatmul.mubr.msk.f32.gmra.mrb[88].mxu0 %vm214_vm1, %v1343_v59 }
 0x506   : > { %3270 = vmatprep.mubr.msk.f32.mxu0 %vm3653_vm0, %v3654_v6 }
 0x508   : > { %v1348_v46 = vpop.f32.mrb[88].mxu1 }
 0x509   : > { %v3225_v1 = vpop.f32.mrb[89].mxu1  ;;  %3271 = vmatmul.mubr.msk.f32.gmra.mrb[90].mxu0 %vm214_vm1, %v1348_v46 }
 0x50a   : > { %3328 = vmatprep.mubr.msk.f32.mxu0 %vm3653_vm0, %v3654_v6 }
 0x5ac   : > { %v1461_v47 = vpop.f32.mrb[66].mxu0 }
 0x5ad   : > { %v1462_v8 = vadd.f32 %v4360_v21, %v1461_v47  ;;  %v3236_v7 = vpop.f32.mrb[67].mxu0 }
 0x5af   : > { %v4364_v61 = vadd.f32 %v1462_v8, %v3805_v42 }
 0x5b0   : > { %v1466_v23 = vpop.f32.mrb[68].mxu0 }
 0x5b1   : > { %v1467_v14 = vadd.f32 %v4360_v21, %v1466_v23  ;;  %v3239_v5 = vpop.f32.mrb[69].mxu0  ;;  %v1538_v25 = vsel %vm214_vm1, %v4364_v61, 0.0 }
 0x5b2   : > { %1539 = vadd.xlane.f32.xlu0 %v1538_v25 }
 0x5b3   : > { %v4370_v33 = vadd.f32 %v1467_v14, %v3827_v52 }
 0x5b4   : > { %v1471_v48 = vpop.f32.mrb[70].mxu0 }
 0x5b5   : > { %v1472_v28 = vadd.f32 %v4360_v21, %v1471_v48  ;;  %v3242_v29 = vpop.f32.mrb[71].mxu0  ;;  %v1541_v17 = vsel %vm214_vm1, %v4370_v33, 0.0 }
 0x5b6   : > { %1542 = vadd.xlane.f32.xlu1 %v1541_v17 }
 0x5b7   : > { %v4376_v42 = vadd.f32 %v1472_v28, %v3842_v60 }
 0x5b8   : > { %v1476_v24 = vpop.f32.mrb[72].mxu0 }
 0x5b9   : > { %v1477_v13 = vadd.f32 %v4360_v21, %v1476_v24  ;;  %v3245_v22 = vpop.f32.mrb[73].mxu0  ;;  %v1544_v35 = vsel %vm214_vm1, %v4376_v42, 0.0 }
 0x5ba   : > { %1545 = vadd.xlane.f32.xlu0 %v1544_v35 }
 0x5bb   : > { %v4382_v52 = vadd.f32 %v1477_v13, %v3857_v4 }
 0x5bc   : > { %v1481_v39 = vpop.f32.mrb[74].mxu0 }
 0x5bd   : > { %v1482_v18 = vadd.f32 %v4360_v21, %v1481_v39  ;;  %v3248_v41 = vpop.f32.mrb[75].mxu0  ;;  %v1547_v32 = vsel %vm214_vm1, %v4382_v52, 0.0 }
 0x5be   : > { %1548 = vadd.xlane.f32.xlu1 %v1547_v32 }
 0x5bf   : > { %v4388_v60 = vadd.f32 %v1482_v18, %v3871_v12 }
 0x5c0   : > { %v1486_v20 = vpop.f32.mrb[76].mxu0 }
 0x5c1   : > { %v1487_v16 = vadd.f32 %v4360_v21, %v1486_v20  ;;  %v3251_v38 = vpop.f32.mrb[77].mxu0  ;;  %v1550_v45 = vsel %vm214_vm1, %v4388_v60, 0.0 }
 0x5c2   : > { %1551 = vadd.xlane.f32.xlu0 %v1550_v45 }
 0x5c3   : > { %v4394_v4 = vadd.f32 %v1487_v16, %v3885_v19 }
 0x5c4   : > { %v1491_v49 = vpop.f32.mrb[78].mxu0 }
 0x5c5   : > { %v1492_v31 = vadd.f32 %v4360_v21, %v1491_v49  ;;  %v3254_v43 = vpop.f32.mrb[79].mxu0  ;;  %v1553_v51 = vsel %vm214_vm1, %v4394_v4, 0.0 }
 0x5c6   : > { %1554 = vadd.xlane.f32.xlu1 %v1553_v51 }
 0x5c7   : > { %v4400_v12 = vadd.f32 %v1492_v31, %v3904_v26 }
 0x5c8   : > { %v1496_v54 = vpop.f32.mrb[80].mxu0 }
 0x5c9   : > { %v1497_v56 = vadd.f32 %v4360_v21, %v1496_v54  ;;  %v3257_v58 = vpop.f32.mrb[81].mxu0  ;;  %v1556_v53 = vsel %vm214_vm1, %v4400_v12, 0.0 }
 0x5ca   : > { %1557 = vadd.xlane.f32.xlu0 %v1556_v53 }
 0x5cb   : > { %v4406_v19 = vadd.f32 %v1497_v56, %v3906_v27 }
 0x5cc   : > { %v1501_v63 = vpop.f32.mrb[82].mxu0 }
 0x5cd   : > { %v1502_v0 = vadd.f32 %v4360_v21, %v1501_v63  ;;  %v3260_v50 = vpop.f32.mrb[83].mxu0  ;;  %v1559_v57 = vsel %vm214_vm1, %v4406_v19, 0.0 }
 0x5ce   : > { %1560 = vadd.xlane.f32.xlu1 %v1559_v57 }
 0x5cf   : > { %v4412_v26 = vadd.f32 %v1502_v0, %v3921_v30 }
 0x5d0   : > { %v1506_v9 = vpop.f32.mrb[84].mxu0 }
 0x5d1   : > { %v1507_v10 = vadd.f32 %v4360_v21, %v1506_v9  ;;  %v3263_v11 = vpop.f32.mrb[85].mxu0  ;;  %v1562_v62 = vsel %vm214_vm1, %v4412_v26, 0.0 }
 0x5d2   : > { %1563 = vadd.xlane.f32.xlu0 %v1562_v62 }
 0x5d3   : > { %v4418_v27 = vadd.f32 %v1507_v10, %v3935_v34 }
 0x5d4   : > { %v1511_v15 = vpop.f32.mrb[86].mxu0 }
 0x5d5   : > { %v1512_v55 = vadd.f32 %v4360_v21, %v1511_v15  ;;  %v3266_v36 = vpop.f32.mrb[87].mxu0  ;;  %v1565_v59 = vsel %vm214_vm1, %v4418_v27, 0.0 }
 0x5d6   : > { %1566 = vadd.xlane.f32.xlu1 %v1565_v59 }
 0x5d7   : > { %v4424_v30 = vadd.f32 %v1512_v55, %v3949_v37 }
 0x5d8   : > { %v1516_v2 = vpop.f32.mrb[88].mxu0 }
 0x5d9   : > { %v1517_v46 = vadd.f32 %v4360_v21, %v1516_v2  ;;  %v3269_v1 = vpop.f32.mrb[89].mxu0  ;;  %v1568_v47 = vsel %vm214_vm1, %v4424_v30, 0.0 }
 0x5da   : > { %1569 = vadd.xlane.f32.xlu0 %v1568_v47  ;;  %v163_v1 = vld [vmem:[%s4989_s1 + $0xb8] sm:$0xff] }
 0x5db   : > { %v4430_v34 = vadd.f32 %v1517_v46, %v3963_v40  ;;  %v160_v40 = vld [vmem:[%s4989_s1 + $0xa0] sm:$0xff]  ;;  %v162_v46 = vld [vmem:[%s4989_s1 + $0xb0] sm:$0xff] }
 0x5dc   : > { %v1521_v8 = vpop.f32.mrb[90].mxu0  ;;  %v3472_v47 = vpack.c.bf16 %v163_v1, %v162_v46 }
 0x5dd   : > { %v1522_v7 = vadd.f32 %v4360_v21, %v1521_v8  ;;  %v3272_v23 = vpop.f32.mrb[91].mxu0  ;;  %v1571_v14 = vsel %vm214_vm1, %v4430_v34, 0.0  ;;  %v161_v21 = vld [vmem:[%s4989_s1 + $0xa8] sm:$0xff] }
 0x5de   : > { %1572 = vadd.xlane.f32.xlu1 %v1571_v14  ;;  %v3469_v25 = vpack.c.bf16 %v161_v21, %v160_v40 }
 0x5df   : > { %v4436_v37 = vadd.f32 %v1522_v7, %v3977_v44 }
 0x5e0   : > { %3470 = vmatpush3.bf16.msra.mxu1 %v3469_v25  ;;  %3476 = vmatpush3.bf16.msra.mxu0 %v3469_v25 }
 0x5e1   : > { %v1575_v5 = vsel %vm1574_vm6, %v4436_v37, 0.0  ;;  %3471 = vmatprep.subr.bf16.mxu1 %v3652_v3  ;;  %3477 = vmatprep.subr.bf16.mxu0 %v3652_v3 }
 0x5e2   : > { %1576 = vadd.xlane.f32.xlu0 %v1575_v5 }
 0x5e4   : > { %3473 = vmatpush3.bf16.msra.mxu1 %v3472_v47  ;;  %3479 = vmatpush3.bf16.msra.mxu0 %v3472_v47 }
 0x5e5   : > { %3480 = vmatprep.subr.bf16.mxu1 %v3652_v3 }
 0x63f   : > { %v1540_v44 = vpop.xlane.xlu0 %1539 }
 0x640   : > { %v1579_v48 = vmul.f32 0.03125, %v1540_v44 }
 0x642   : > { %v4449_v28 = vsub.f32 %v4364_v61, %v1579_v48 }
 0x643   : > { %v1543_v29 = vpop.xlane.xlu1 %1542 }
 0x644   : > { %v1580_v17 = vmul.f32 0.03125, %v1543_v29  ;;  %v1605_v24 = vmul.f32 %v4449_v28, %v4449_v28 }
 0x646   : > { %v4454_v13 = vsub.f32 %v4370_v33, %v1580_v17  ;;  %v1618_v22 = vsel %vm214_vm1, %v1605_v24, 0.0 }
 0x647   : > { %v1546_v35 = vpop.xlane.xlu0 %1545  ;;  %1619 = vadd.xlane.f32.xlu1 %v1618_v22 }
 0x648   : > { %v1581_v39 = vmul.f32 0.03125, %v1546_v35  ;;  %v1606_v18 = vmul.f32 %v4454_v13, %v4454_v13 }
 0x64a   : > { %v4460_v41 = vsub.f32 %v4376_v42, %v1581_v39  ;;  %v1621_v61 = vsel %vm214_vm1, %v1606_v18, 0.0 }
 0x64b   : > { %v1549_v32 = vpop.xlane.xlu1 %1548  ;;  %1622 = vadd.xlane.f32.xlu0 %v1621_v61 }
 0x64c   : > { %v1582_v20 = vmul.f32 0.03125, %v1549_v32  ;;  %v1607_v33 = vmul.f32 %v4460_v41, %v4460_v41 }
 0x64e   : > { %v4466_v16 = vsub.f32 %v4382_v52, %v1582_v20  ;;  %v1624_v38 = vsel %vm214_vm1, %v1607_v33, 0.0 }
 0x64f   : > { %v1552_v45 = vpop.xlane.xlu0 %1551  ;;  %1625 = vadd.xlane.f32.xlu1 %v1624_v38 }
 0x650   : > { %v1583_v49 = vmul.f32 0.03125, %v1552_v45  ;;  %v1608_v42 = vmul.f32 %v4466_v16, %v4466_v16 }
 0x652   : > { %v4472_v31 = vsub.f32 %v4388_v60, %v1583_v49  ;;  %v1627_v43 = vsel %vm214_vm1, %v1608_v42, 0.0 }
 0x653   : > { %v1555_v51 = vpop.xlane.xlu1 %1554  ;;  %1628 = vadd.xlane.f32.xlu0 %v1627_v43 }
 0x654   : > { %v1584_v54 = vmul.f32 0.03125, %v1555_v51  ;;  %v1609_v52 = vmul.f32 %v4472_v31, %v4472_v31  ;;  %v4536_v51 = vld [vmem:[%s4989_s1 + $0xc2] ss:$0 sm:$0xff] }
 0x656   : > { %v4478_v56 = vsub.f32 %v4394_v4, %v1584_v54  ;;  %v1630_v58 = vsel %vm214_vm1, %v1609_v52, 0.0 }
 0x657   : > { %v1558_v53 = vpop.xlane.xlu0 %1557  ;;  %1631 = vadd.xlane.f32.xlu1 %v1630_v58 }
 0x658   : > { %v1585_v63 = vmul.f32 0.03125, %v1558_v53  ;;  %v1610_v60 = vmul.f32 %v4478_v56, %v4478_v56  ;;  %v4542_v53 = vld [vmem:[%s4989_s1 + $0xc3] ss:$0 sm:$0xff] }
 0x65a   : > { %v4484_v0 = vsub.f32 %v4400_v12, %v1585_v63  ;;  %v1633_v50 = vsel %vm214_vm1, %v1610_v60, 0.0 }
 0x65b   : > { %v1561_v57 = vpop.xlane.xlu1 %1560  ;;  %1634 = vadd.xlane.f32.xlu0 %v1633_v50 }
 0x65c   : > { %v1586_v9 = vmul.f32 0.03125, %v1561_v57  ;;  %v1611_v4 = vmul.f32 %v4484_v0, %v4484_v0 }
 0x65e   : > { %v4490_v10 = vsub.f32 %v4406_v19, %v1586_v9  ;;  %v1636_v11 = vsel %vm214_vm1, %v1611_v4, 0.0 }
 0x65f   : > { %v1564_v62 = vpop.xlane.xlu0 %1563  ;;  %1637 = vadd.xlane.f32.xlu1 %v1636_v11 }
 0x660   : > { %v1587_v15 = vmul.f32 0.03125, %v1564_v62  ;;  %v1612_v12 = vmul.f32 %v4490_v10, %v4490_v10 }
 0x662   : > { %v4496_v55 = vsub.f32 %v4412_v26, %v1587_v15  ;;  %v1639_v36 = vsel %vm214_vm1, %v1612_v12, 0.0 }
 0x663   : > { %v1567_v59 = vpop.xlane.xlu1 %1566  ;;  %1640 = vadd.xlane.f32.xlu0 %v1639_v36 }
 0x664   : > { %v1588_v2 = vmul.f32 0.03125, %v1567_v59  ;;  %v1613_v19 = vmul.f32 %v4496_v55, %v4496_v55 }
 0x666   : > { %v4508_v26 = vsub.f32 %v4418_v27, %v1588_v2  ;;  %v1642_v8 = vsel %vm214_vm1, %v1613_v19, 0.0 }
 0x667   : > { %v1570_v7 = vpop.xlane.xlu0 %1569  ;;  %1643 = vadd.xlane.f32.xlu1 %v1642_v8 }
 0x668   : > { %v1589_v23 = vmul.f32 0.03125, %v1570_v7  ;;  %v1614_v14 = vmul.f32 %v4508_v26, %v4508_v26 }
 0x66a   : > { %v4515_v5 = vsub.f32 %v4424_v30, %v1589_v23  ;;  %v1645_v40 = vsel %vm214_vm1, %v1614_v14, 0.0 }
 0x66b   : > { %v1573_v21 = vpop.xlane.xlu1 %1572  ;;  %1646 = vadd.xlane.f32.xlu0 %v1645_v40 }
 0x66c   : > { %v1590_v27 = vmul.f32 0.03125, %v1573_v21  ;;  %v1615_v25 = vmul.f32 %v4515_v5, %v4515_v5 }
 0x66e   : > { %v4521_v44 = vsub.f32 %v4430_v34, %v1590_v27  ;;  %v1648_v48 = vsel %vm214_vm1, %v1615_v25, 0.0 }
 0x66f   : > { %1649 = vadd.xlane.f32.xlu1 %v1648_v48  ;;  %v1577_v29 = vpop.xlane.xlu0 %1576 }
 0x670   : > { %v1591_v17 = vmul.f32 0.03125, %v1577_v29  ;;  %v1616_v30 = vmul.f32 %v4521_v44, %v4521_v44 }
 0x672   : > { %v4527_v24 = vsub.f32 %v4436_v37, %v1591_v17  ;;  %v1651_v22 = vsel %vm214_vm1, %v1616_v30, 0.0 }
 0x673   : > { %1652 = vadd.xlane.f32.xlu0 %v1651_v22 }
 0x674   : > { %v1617_v35 = vmul.f32 %v4527_v24, %v4527_v24 }
 0x676   : > { %v1654_v34 = vsel %vm1574_vm6, %v1617_v35, 0.0 }
 0x677   : > { %1655 = vadd.xlane.f32.xlu1 %v1654_v34 }
 0x6d4   : > { %v1620_v39 = vpop.xlane.xlu1 %1619 }
 0x6d5   : > { %v1657_v18 = vmul.f32 0.03125, %v1620_v39 }
 0x6d7   : > { %v1670_v61 = vadd.f32 1e-05, %v1657_v18 }
 0x6d8   : > { %v1623_v32 = vpop.xlane.xlu0 %1622 }
 0x6d9   : > { %3566 = vrsqrt.f32 %v1670_v61  ;;  %v1658_v20 = vmul.f32 0.03125, %v1623_v32 }
 0x6db   : > { %v1671_v33 = vadd.f32 1e-05, %v1658_v20 }
 0x6dc   : > { %v1626_v38 = vpop.xlane.xlu1 %1625 }
 0x6dd   : > { %3568 = vrsqrt.f32 %v1671_v33  ;;  %v1659_v37 = vmul.f32 0.03125, %v1626_v38 }
 0x6df   : > { %v1672_v45 = vadd.f32 1e-05, %v1659_v37 }
 0x6e0   : > { %v1629_v49 = vpop.xlane.xlu0 %1628 }
 0x6e1   : > { %3570 = vrsqrt.f32 %v1672_v45  ;;  %v1660_v42 = vmul.f32 0.03125, %v1629_v49 }
 0x6e3   : > { %v3567_v43 = vpop.eup %3566  ;;  %v1673_v54 = vadd.f32 1e-05, %v1660_v42 }
 0x6e4   : > { %v1696_v52 = vmul.f32 %v3567_v43, %v4449_v28  ;;  %v1632_v58 = vpop.xlane.xlu1 %1631 }
 0x6e5   : > { %3572 = vrsqrt.f32 %v1673_v54  ;;  %v1661_v63 = vmul.f32 0.03125, %v1632_v58 }
 0x6e6   : > { %v1713_v60 = vmul.f32 %v4536_v51, %v1696_v52 }
 0x6e7   : > { %v3569_v50 = vpop.eup %3568  ;;  %v1674_v57 = vadd.f32 1e-05, %v1661_v63 }
 0x6e8   : > { %v4546_v9 = vadd.f32 %v4542_v53, %v1713_v60  ;;  %v1635_v4 = vpop.xlane.xlu0 %1634  ;;  %v1697_v11 = vmul.f32 %v3569_v50, %v4454_v13 }
 0x6e9   : > { %3574 = vrsqrt.f32 %v1674_v57  ;;  %v1662_v28 = vmul.f32 0.03125, %v1635_v4 }
 0x6ea   : > { %3282 = vmatmul.mubr.msk.f32.vlgmr.msra.gmra.mrb[90].mxu1 %vm214_vm1, %v4546_v9  ;;  %v1714_v62 = vmul.f32 %v4536_v51, %v1697_v11 }
 0x6eb   : > { %v3571_v15 = vpop.eup %3570  ;;  %v1675_v12 = vadd.f32 1e-05, %v1662_v28  ;;  %3284 = vmatprep.mubr.msk.f32.mxu1 %vm3653_vm0, %v3654_v6 }
 0x6ec   : > { %v1638_v36 = vpop.xlane.xlu1 %1637  ;;  %v4555_v59 = vadd.f32 %v4542_v53, %v1714_v62  ;;  %v1698_v2 = vmul.f32 %v3571_v15, %v4460_v41 }
 0x6ed   : > { %3576 = vrsqrt.f32 %v1675_v12  ;;  %v1663_v13 = vmul.f32 0.03125, %v1638_v36 }
 0x6ee   : > { %3285 = vmatmul.mubr.msk.f32.gmra.mrb[92].mxu1 %vm214_vm1, %v4555_v59  ;;  %v1715_v19 = vmul.f32 %v4536_v51, %v1698_v2 }
 0x6ef   : > { %v3573_v46 = vpop.eup %3572  ;;  %v1676_v1 = vadd.f32 1e-05, %v1663_v13  ;;  %3287 = vmatprep.mubr.msk.f32.mxu1 %vm3653_vm0, %v3654_v6 }
 0x6f0   : > { %v1641_v47 = vpop.xlane.xlu0 %1640  ;;  %v4564_v8 = vadd.f32 %v4542_v53, %v1715_v19  ;;  %v1699_v7 = vmul.f32 %v3573_v46, %v4466_v16 }
 0x6f1   : > { %3578 = vrsqrt.f32 %v1676_v1  ;;  %v1664_v41 = vmul.f32 0.03125, %v1641_v47 }
 0x6f2   : > { %3288 = vmatmul.mubr.msk.f32.gmra.mrb[94].mxu1 %vm214_vm1, %v4564_v8  ;;  %v1716_v23 = vmul.f32 %v4536_v51, %v1699_v7 }
 0x6f3   : > { %v3575_v14 = vpop.eup %3574  ;;  %v1677_v40 = vadd.f32 1e-05, %v1664_v41  ;;  %3290 = vmatprep.mubr.msk.f32.mxu1 %vm3653_vm0, %v3654_v6 }
 0x6f4   : > { %v1644_v21 = vpop.xlane.xlu1 %1643  ;;  %v4573_v27 = vadd.f32 %v4542_v53, %v1716_v23  ;;  %v1700_v25 = vmul.f32 %v3575_v14, %v4472_v31 }
 0x6f5   : > { %3580 = vrsqrt.f32 %v1677_v40  ;;  %v1665_v16 = vmul.f32 0.03125, %v1644_v21 }
 0x6f6   : > { %3291 = vmatmul.mubr.msk.f32.gmra.mrb[96].mxu1 %vm214_vm1, %v4573_v27  ;;  %v1717_v48 = vmul.f32 %v4536_v51, %v1700_v25 }
 0x6f7   : > { %v3577_v29 = vpop.eup %3576  ;;  %v1678_v17 = vadd.f32 1e-05, %v1665_v16  ;;  %3293 = vmatprep.mubr.msk.f32.mxu1 %vm3653_vm0, %v3654_v6 }
 0x6f8   : > { %v1647_v30 = vpop.xlane.xlu0 %1646  ;;  %v4582_v22 = vadd.f32 %v4542_v53, %v1717_v48  ;;  %v1701_v35 = vmul.f32 %v3577_v29, %v4478_v56 }
 0x6f9   : > { %3582 = vrsqrt.f32 %v1678_v17  ;;  %v1666_v31 = vmul.f32 0.03125, %v1647_v30 }
 0x6fa   : > { %3294 = vmatmul.mubr.msk.f32.gmra.mrb[98].mxu1 %vm214_vm1, %v4582_v22  ;;  %v1718_v34 = vmul.f32 %v4536_v51, %v1701_v35 }
 0x6fb   : > { %v3579_v39 = vpop.eup %3578  ;;  %v1679_v18 = vadd.f32 1e-05, %v1666_v31  ;;  %3296 = vmatprep.mubr.msk.f32.mxu1 %vm3653_vm0, %v3654_v6 }
 0x6fc   : > { %v1650_v61 = vpop.xlane.xlu1 %1649  ;;  %v4591_v32 = vadd.f32 %v4542_v53, %v1718_v34  ;;  %v1702_v20 = vmul.f32 %v3579_v39, %v4484_v0 }
 0x6fd   : > { %3584 = vrsqrt.f32 %v1679_v18  ;;  %v1667_v56 = vmul.f32 0.03125, %v1650_v61 }
 0x6fe   : > { %3297 = vmatmul.mubr.msk.f32.gmra.mrb[100].mxu1 %vm214_vm1, %v4591_v32  ;;  %v1719_v33 = vmul.f32 %v4536_v51, %v1702_v20 }
 0x6ff   : > { %v3581_v38 = vpop.eup %3580  ;;  %v1680_v37 = vadd.f32 1e-05, %v1667_v56  ;;  %3299 = vmatprep.mubr.msk.f32.mxu1 %vm3653_vm0, %v3654_v6 }
 0x700   : > { %v1653_v45 = vpop.xlane.xlu0 %1652  ;;  %v4600_v49 = vadd.f32 %v4542_v53, %v1719_v33  ;;  %v1703_v42 = vmul.f32 %v3581_v38, %v4490_v10 }
 0x701   : > { %3586 = vrsqrt.f32 %v1680_v37  ;;  %v1668_v0 = vmul.f32 0.03125, %v1653_v45 }
 0x702   : > { %3300 = vmatmul.mubr.msk.f32.gmra.mrb[102].mxu1 %vm214_vm1, %v4600_v49  ;;  %v1720_v43 = vmul.f32 %v4536_v51, %v1703_v42 }
 0x703   : > { %v3583_v54 = vpop.eup %3582  ;;  %v1681_v52 = vadd.f32 1e-05, %v1668_v0  ;;  %3302 = vmatprep.mubr.msk.f32.mxu1 %vm3653_vm0, %v3654_v6 }
 0x704   : > { %v1656_v58 = vpop.xlane.xlu1 %1655  ;;  %v4609_v63 = vadd.f32 %v4542_v53, %v1720_v43  ;;  %v1704_v60 = vmul.f32 %v3583_v54, %v4496_v55 }
 0x705   : > { %3588 = vrsqrt.f32 %v1681_v52  ;;  %v1669_v10 = vmul.f32 0.03125, %v1656_v58 }
 0x706   : > { %3303 = vmatmul.mubr.msk.f32.gmra.mrb[104].mxu1 %vm214_vm1, %v4609_v63  ;;  %v1721_v50 = vmul.f32 %v4536_v51, %v1704_v60 }
 0x707   : > { %v3585_v57 = vpop.eup %3584  ;;  %v1682_v4 = vadd.f32 1e-05, %v1669_v10  ;;  %3305 = vmatprep.mubr.msk.f32.mxu1 %vm3653_vm0, %v3654_v6 }
 0x708   : > { %v4618_v11 = vadd.f32 %v4542_v53, %v1721_v50  ;;  %v1705_v28 = vmul.f32 %v3585_v57, %v4508_v26 }
 0x709   : > { %3590 = vrsqrt.f32 %v1682_v4 }
 0x70a   : > { %3306 = vmatmul.mubr.msk.f32.gmra.mrb[106].mxu1 %vm214_vm1, %v4618_v11  ;;  %v1722_v55 = vmul.f32 %v4536_v51, %v1705_v28 }
 0x70b   : > { %v3587_v62 = vpop.eup %3586  ;;  %3308 = vmatprep.mubr.msk.f32.mxu1 %vm3653_vm0, %v3654_v6 }
 0x70c   : > { %v4627_v15 = vadd.f32 %v4542_v53, %v1722_v55  ;;  %v1706_v12 = vmul.f32 %v3587_v62, %v4515_v5 }
 0x70e   : > { %3309 = vmatmul.mubr.msk.f32.gmra.mrb[108].mxu1 %vm214_vm1, %v4627_v15  ;;  %v1723_v26 = vmul.f32 %v4536_v51, %v1706_v12 }
 0x70f   : > { %v3589_v36 = vpop.eup %3588  ;;  %3311 = vmatprep.mubr.msk.f32.mxu1 %vm3653_vm0, %v3654_v6 }
 0x710   : > { %v4636_v2 = vadd.f32 %v4542_v53, %v1723_v26  ;;  %v1707_v13 = vmul.f32 %v3589_v36, %v4521_v44 }
 0x712   : > { %3312 = vmatmul.mubr.msk.f32.gmra.mrb[110].mxu1 %vm214_vm1, %v4636_v2  ;;  %v1724_v19 = vmul.f32 %v4536_v51, %v1707_v13 }
 0x713   : > { %v3591_v5 = vpop.eup %3590  ;;  %3314 = vmatprep.mubr.msk.f32.mxu1 %vm3653_vm0, %v3654_v6 }
 0x714   : > { %v4645_v46 = vadd.f32 %v4542_v53, %v1724_v19  ;;  %v1708_v1 = vmul.f32 %v3591_v5, %v4527_v24  ;;  %v4663_v24 = vld [vmem:[%s4989_s1 + $0xc4] ss:$0 sm:$0xff] }
 0x716   : > { %3315 = vmatmul.mubr.msk.f32.gmra.mrb[112].mxu1 %vm214_vm1, %v4645_v46  ;;  %v1725_v47 = vmul.f32 %v4536_v51, %v1708_v1 }
 0x717   : > { %3317 = vmatprep.mubr.msk.f32.mxu1 %vm3653_vm0, %v3654_v6 }
 0x718   : > { %v4654_v44 = vadd.f32 %v4542_v53, %v1725_v47 }
 0x71a   : > { %3318 = vmatmul.mubr.msk.f32.gmra.mrb[114].mxu1 %vm214_vm1, %v4654_v44 }
 0x71b   : > { %3393 = vmatprep.mubr.msk.f32.mxu1 %vm3653_vm0, %v3654_v6 }
 0x7bd   : > { %v1852_v7 = vpop.f32.mrb[90].mxu1 }
 0x7be   : > { %v1853_v51 = vadd.f32 %v4663_v24, %v1852_v7  ;;  %v3283_v41 = vpop.f32.mrb[91].mxu1 }
 0x7c0   : > { %v1929_v23 = vmin.f32 %v1853_v51, 0.0  ;;  %vm1916_vm7 = vcmp.gt.f32.partialorder %v1853_v51, 0.0 }
 0x7c1   : > { %v1857_v14 = vpop.f32.mrb[92].mxu1 }
 0x7c2   : > { %v1942_v40 = vmul.f32 1.442695, %v1929_v23  ;;  %v1858_v53 = vadd.f32 %v4663_v24, %v1857_v14  ;;  %v3286_v21 = vpop.f32.mrb[93].mxu1 }
 0x7c4   : > { %3592 = vpow2.f32 %v1942_v40  ;;  %v1930_v25 = vmin.f32 %v1858_v53, 0.0  ;;  %vm1917_vm8 = vcmp.gt.f32.partialorder %v1858_v53, 0.0 }
 0x7c5   : > { %v1862_v16 = vpop.f32.mrb[94].mxu1 }
 0x7c6   : > { %v1944_v48 = vmul.f32 1.442695, %v1930_v25  ;;  %v1863_v29 = vadd.f32 %v4663_v24, %v1862_v16  ;;  %v3289_v17 = vpop.f32.mrb[95].mxu1 }
 0x7c8   : > { %3594 = vpow2.f32 %v1944_v48  ;;  %v1931_v30 = vmin.f32 %v1863_v29, 0.0  ;;  %vm1918_vm9 = vcmp.gt.f32.partialorder %v1863_v29, 0.0 }
 0x7c9   : > { %v1867_v35 = vpop.f32.mrb[96].mxu1 }
 0x7ca   : > { %v1946_v31 = vmul.f32 1.442695, %v1931_v30  ;;  %v1868_v34 = vadd.f32 %v4663_v24, %v1867_v35  ;;  %v3292_v39 = vpop.f32.mrb[97].mxu1 }
 0x7cc   : > { %3596 = vpow2.f32 %v1946_v31  ;;  %v1932_v18 = vmin.f32 %v1868_v34, 0.0  ;;  %vm1919_vm10 = vcmp.gt.f32.partialorder %v1868_v34, 0.0 }
 0x7cd   : > { %v1872_v61 = vpop.f32.mrb[98].mxu1 }
 0x7ce   : > { %v3593_v20 = vpop.eup %3592  ;;  %v1948_v56 = vmul.f32 1.442695, %v1932_v18  ;;  %v1873_v33 = vadd.f32 %v4663_v24, %v1872_v61  ;;  %v3295_v38 = vpop.f32.mrb[99].mxu1 }
 0x7cf   : > { %v2690_v37 = vadd.f32 -1.0, %v3593_v20 }
 0x7d0   : > { %3598 = vpow2.f32 %v1948_v56  ;;  %v1933_v45 = vmin.f32 %v1873_v33, 0.0  ;;  %vm1920_vm11 = vcmp.gt.f32.partialorder %v1873_v33, 0.0 }
 0x7d1   : > { %v1981_v42 = vsel %vm1916_vm7, %v1853_v51, %v2690_v37  ;;  %v1877_v0 = vpop.f32.mrb[100].mxu1 }
 0x7d2   : > { %v3595_v43 = vpop.eup %3594  ;;  %v1950_v54 = vmul.f32 1.442695, %v1933_v45  ;;  %v1878_v52 = vadd.f32 %v4663_v24, %v1877_v0  ;;  %v3298_v58 = vpop.f32.mrb[101].mxu1  ;;  %3329 = vmatmul.mubr.msk.f32.vlgmr.msra.gmra.mrb[92].mxu0 %vm214_vm1, %v1981_v42 }
 0x7d3   : > { %3331 = vmatprep.mubr.msk.f32.mxu0 %vm3653_vm0, %v3654_v6  ;;  %v2691_v60 = vadd.f32 -1.0, %v3595_v43 }
 0x7d4   : > { %3600 = vpow2.f32 %v1950_v54  ;;  %v1934_v10 = vmin.f32 %v1878_v52, 0.0  ;;  %vm1921_vm12 = vcmp.gt.f32.partialorder %v1878_v52, 0.0 }
 0x7d5   : > { %v1882_v50 = vpop.f32.mrb[102].mxu1  ;;  %v1982_v57 = vsel %vm1917_vm8, %v1858_v53, %v2691_v60 }
 0x7d6   : > { %v3597_v4 = vpop.eup %3596  ;;  %v1952_v28 = vmul.f32 1.442695, %v1934_v10  ;;  %v1883_v55 = vadd.f32 %v4663_v24, %v1882_v50  ;;  %v3301_v62 = vpop.f32.mrb[103].mxu1  ;;  %3332 = vmatmul.mubr.msk.f32.gmra.mrb[94].mxu0 %vm214_vm1, %v1982_v57 }
 0x7d7   : > { %3334 = vmatprep.mubr.msk.f32.mxu0 %vm3653_vm0, %v3654_v6  ;;  %v2692_v12 = vadd.f32 -1.0, %v3597_v4 }
 0x7d8   : > { %3602 = vpow2.f32 %v1952_v28  ;;  %v1935_v26 = vmin.f32 %v1883_v55, 0.0  ;;  %vm1922_vm13 = vcmp.gt.f32.partialorder %v1883_v55, 0.0 }
 0x7d9   : > { %v1887_v36 = vpop.f32.mrb[104].mxu1  ;;  %v1983_v13 = vsel %vm1918_vm9, %v1863_v29, %v2692_v12 }
 0x7da   : > { %v3599_v19 = vpop.eup %3598  ;;  %v1954_v5 = vmul.f32 1.442695, %v1935_v26  ;;  %v1888_v1 = vadd.f32 %v4663_v24, %v1887_v36  ;;  %v3304_v47 = vpop.f32.mrb[105].mxu1  ;;  %3335 = vmatmul.mubr.msk.f32.gmra.mrb[96].mxu0 %vm214_vm1, %v1983_v13 }
 0x7db   : > { %3337 = vmatprep.mubr.msk.f32.mxu0 %vm3653_vm0, %v3654_v6  ;;  %v2693_v7 = vadd.f32 -1.0, %v3599_v19 }
 0x7dc   : > { %3604 = vpow2.f32 %v1954_v5  ;;  %v1936_v51 = vmin.f32 %v1888_v1, 0.0  ;;  %vm1923_vm14 = vcmp.gt.f32.partialorder %v1888_v1, 0.0 }
 0x7dd   : > { %v1892_v41 = vpop.f32.mrb[106].mxu1  ;;  %v1984_v23 = vsel %vm1919_vm10, %v1868_v34, %v2693_v7 }
 0x7de   : > { %v3601_v14 = vpop.eup %3600  ;;  %v1956_v40 = vmul.f32 1.442695, %v1936_v51  ;;  %v1893_v53 = vadd.f32 %v4663_v24, %v1892_v41  ;;  %v3307_v21 = vpop.f32.mrb[107].mxu1  ;;  %3338 = vmatmul.mubr.msk.f32.gmra.mrb[98].mxu0 %vm214_vm1, %v1984_v23 }
 0x7df   : > { %3340 = vmatprep.mubr.msk.f32.mxu0 %vm3653_vm0, %v3654_v6  ;;  %v2694_v25 = vadd.f32 -1.0, %v3601_v14 }
 0x7e0   : > { %3606 = vpow2.f32 %v1956_v40  ;;  %v1937_v16 = vmin.f32 %v1893_v53, 0.0  ;;  %vm1924_vm15 = vcmp.gt.f32.partialorder %v1893_v53, 0.0 }
 0x7e1   : > { %v1897_v48 = vpop.f32.mrb[108].mxu1  ;;  %v1985_v29 = vsel %vm1920_vm11, %v1873_v33, %v2694_v25 }
 0x7e2   : > { %v3603_v17 = vpop.eup %3602  ;;  %v1958_v30 = vmul.f32 1.442695, %v1937_v16  ;;  %v1898_v35 = vadd.f32 %v4663_v24, %v1897_v48  ;;  %v3310_v31 = vpop.f32.mrb[109].mxu1  ;;  %3341 = vmatmul.mubr.msk.f32.gmra.mrb[100].mxu0 %vm214_vm1, %v1985_v29 }
 0x7e3   : > { %3343 = vmatprep.mubr.msk.f32.mxu0 %vm3653_vm0, %v3654_v6  ;;  %v2695_v34 = vadd.f32 -1.0, %v3603_v17 }
 0x7e4   : > { %3608 = vpow2.f32 %v1958_v30  ;;  %v1938_v39 = vmin.f32 %v1898_v35, 0.0  ;;  %vm1925_vm2 = vcmp.gt.f32.partialorder %v1898_v35, 0.0 }
 0x7e5   : > { %v1902_v18 = vpop.f32.mrb[110].mxu1  ;;  %v1986_v61 = vsel %vm1921_vm12, %v1878_v52, %v2695_v34 }
 0x7e6   : > { %v3605_v20 = vpop.eup %3604  ;;  %v1960_v56 = vmul.f32 1.442695, %v1938_v39  ;;  %v1903_v33 = vadd.f32 %v4663_v24, %v1902_v18  ;;  %v3313_v38 = vpop.f32.mrb[111].mxu1  ;;  %3344 = vmatmul.mubr.msk.f32.gmra.mrb[102].mxu0 %vm214_vm1, %v1986_v61 }
 0x7e7   : > { %3346 = vmatprep.mubr.msk.f32.mxu0 %vm3653_vm0, %v3654_v6  ;;  %v2696_v37 = vadd.f32 -1.0, %v3605_v20 }
 0x7e8   : > { %3610 = vpow2.f32 %v1960_v56  ;;  %v1939_v45 = vmin.f32 %v1903_v33, 0.0  ;;  %vm1926_vm5 = vcmp.gt.f32.partialorder %v1903_v33, 0.0 }
 0x7e9   : > { %v1907_v42 = vpop.f32.mrb[112].mxu1  ;;  %v1987_v0 = vsel %vm1922_vm13, %v1883_v55, %v2696_v37 }
 0x7ea   : > { %v3607_v43 = vpop.eup %3606  ;;  %v1962_v54 = vmul.f32 1.442695, %v1939_v45  ;;  %v1908_v52 = vadd.f32 %v4663_v24, %v1907_v42  ;;  %v3316_v58 = vpop.f32.mrb[113].mxu1  ;;  %3347 = vmatmul.mubr.msk.f32.gmra.mrb[104].mxu0 %vm214_vm1, %v1987_v0 }
 0x7eb   : > { %3349 = vmatprep.mubr.msk.f32.mxu0 %vm3653_vm0, %v3654_v6  ;;  %v2697_v60 = vadd.f32 -1.0, %v3607_v43 }
 0x7ec   : > { %3612 = vpow2.f32 %v1962_v54  ;;  %v1940_v10 = vmin.f32 %v1908_v52, 0.0  ;;  %vm1927_vm7 = vcmp.gt.f32.partialorder %v1908_v52, 0.0 }
 0x7ed   : > { %v1912_v50 = vpop.f32.mrb[114].mxu1  ;;  %v1988_v57 = vsel %vm1923_vm14, %v1888_v1, %v2697_v60 }
 0x7ee   : > { %v3609_v4 = vpop.eup %3608  ;;  %v1964_v28 = vmul.f32 1.442695, %v1940_v10  ;;  %v1913_v55 = vadd.f32 %v4663_v24, %v1912_v50  ;;  %v3319_v62 = vpop.f32.mrb[115].mxu1  ;;  %3350 = vmatmul.mubr.msk.f32.gmra.mrb[106].mxu0 %vm214_vm1, %v1988_v57 }
 0x7ef   : > { %3352 = vmatprep.mubr.msk.f32.mxu0 %vm3653_vm0, %v3654_v6  ;;  %v2698_v12 = vadd.f32 -1.0, %v3609_v4 }
 0x7f0   : > { %3614 = vpow2.f32 %v1964_v28  ;;  %v1941_v26 = vmin.f32 %v1913_v55, 0.0  ;;  %vm1928_vm8 = vcmp.gt.f32.partialorder %v1913_v55, 0.0 }
 0x7f1   : > { %v1989_v36 = vsel %vm1924_vm15, %v1893_v53, %v2698_v12 }
 0x7f2   : > { %v3611_v13 = vpop.eup %3610  ;;  %v1966_v19 = vmul.f32 1.442695, %v1941_v26  ;;  %3353 = vmatmul.mubr.msk.f32.gmra.mrb[108].mxu0 %vm214_vm1, %v1989_v36 }
 0x7f3   : > { %3355 = vmatprep.mubr.msk.f32.mxu0 %vm3653_vm0, %v3654_v6  ;;  %v2699_v5 = vadd.f32 -1.0, %v3611_v13 }
 0x7f4   : > { %3616 = vpow2.f32 %v1966_v19 }
 0x7f5   : > { %v1990_v1 = vsel %vm1925_vm2, %v1898_v35, %v2699_v5 }
 0x7f6   : > { %v3613_v47 = vpop.eup %3612  ;;  %3356 = vmatmul.mubr.msk.f32.gmra.mrb[110].mxu0 %vm214_vm1, %v1990_v1 }
 0x7f7   : > { %3358 = vmatprep.mubr.msk.f32.mxu0 %vm3653_vm0, %v3654_v6  ;;  %v2700_v7 = vadd.f32 -1.0, %v3613_v47 }
 0x7f9   : > { %v1991_v51 = vsel %vm1926_vm5, %v1903_v33, %v2700_v7 }
 0x7fa   : > { %v3615_v41 = vpop.eup %3614  ;;  %3359 = vmatmul.mubr.msk.f32.gmra.mrb[112].mxu0 %vm214_vm1, %v1991_v51 }
 0x7fb   : > { %3361 = vmatprep.mubr.msk.f32.mxu0 %vm3653_vm0, %v3654_v6  ;;  %v2701_v23 = vadd.f32 -1.0, %v3615_v41 }
 0x7fd   : > { %v1992_v14 = vsel %vm1927_vm7, %v1908_v52, %v2701_v23 }
 0x7fe   : > { %v3617_v40 = vpop.eup %3616  ;;  %3362 = vmatmul.mubr.msk.f32.gmra.mrb[114].mxu0 %vm214_vm1, %v1992_v14 }
 0x7ff   : > { %3364 = vmatprep.mubr.msk.f32.mxu0 %vm3653_vm0, %v3654_v6  ;;  %v2702_v53 = vadd.f32 -1.0, %v3617_v40 }
 0x801   : > { %v1993_v21 = vsel %vm1928_vm8, %v1913_v55, %v2702_v53 }
 0x802   : > { %3365 = vmatmul.mubr.msk.f32.gmra.mrb[116].mxu0 %vm214_vm1, %v1993_v21 }
 0x8a5   : > { %v2099_v25 = vpop.f32.mrb[92].mxu0 }
 0x8a6   : > { %v2100_v16 = vadd.f32 %v4663_v24, %v2099_v25  ;;  %v3330_v48 = vpop.f32.mrb[93].mxu0 }
 0x8a8   : > { %v4717_v29 = vadd.f32 %v2100_v16, %v4546_v9 }
 0x8a9   : > { %v2104_v17 = vpop.f32.mrb[94].mxu0 }
 0x8aa   : > { %v2105_v30 = vadd.f32 %v4663_v24, %v2104_v17  ;;  %v3333_v35 = vpop.f32.mrb[95].mxu0  ;;  %v2176_v31 = vsel %vm214_vm1, %v4717_v29, 0.0 }
 0x8ab   : > { %2177 = vadd.xlane.f32.xlu0 %v2176_v31 }
 0x8ac   : > { %v4723_v34 = vadd.f32 %v2105_v30, %v4555_v59 }
 0x8ad   : > { %v2109_v39 = vpop.f32.mrb[96].mxu0 }
 0x8ae   : > { %v2110_v18 = vadd.f32 %v4663_v24, %v2109_v39  ;;  %v3336_v61 = vpop.f32.mrb[97].mxu0  ;;  %v2179_v20 = vsel %vm214_vm1, %v4723_v34, 0.0 }
 0x8af   : > { %2180 = vadd.xlane.f32.xlu1 %v2179_v20 }
 0x8b0   : > { %v4729_v9 = vadd.f32 %v2110_v18, %v4564_v8 }
 0x8b1   : > { %v2114_v56 = vpop.f32.mrb[98].mxu0 }
 0x8b2   : > { %v2115_v33 = vadd.f32 %v4663_v24, %v2114_v56  ;;  %v3339_v38 = vpop.f32.mrb[99].mxu0  ;;  %v2182_v37 = vsel %vm214_vm1, %v4729_v9, 0.0 }
 0x8b3   : > { %2183 = vadd.xlane.f32.xlu0 %v2182_v37 }
 0x8b4   : > { %v4735_v59 = vadd.f32 %v2115_v33, %v4573_v27 }
 0x8b5   : > { %v2119_v45 = vpop.f32.mrb[100].mxu0 }
 0x8b6   : > { %v2120_v42 = vadd.f32 %v4663_v24, %v2119_v45  ;;  %v3342_v0 = vpop.f32.mrb[101].mxu0  ;;  %v2185_v43 = vsel %vm214_vm1, %v4735_v59, 0.0 }
 0x8b7   : > { %2186 = vadd.xlane.f32.xlu1 %v2185_v43 }
 0x8b8   : > { %v4741_v8 = vadd.f32 %v2120_v42, %v4582_v22 }
 0x8b9   : > { %v2124_v54 = vpop.f32.mrb[102].mxu0 }
 0x8ba   : > { %v2125_v52 = vadd.f32 %v4663_v24, %v2124_v54  ;;  %v3345_v58 = vpop.f32.mrb[103].mxu0  ;;  %v2188_v60 = vsel %vm214_vm1, %v4741_v8, 0.0 }
 0x8bb   : > { %2189 = vadd.xlane.f32.xlu0 %v2188_v60 }
 0x8bc   : > { %v4747_v27 = vadd.f32 %v2125_v52, %v4591_v32 }
 0x8bd   : > { %v2129_v10 = vpop.f32.mrb[104].mxu0 }
 0x8be   : > { %v2130_v50 = vadd.f32 %v4663_v24, %v2129_v10  ;;  %v3348_v57 = vpop.f32.mrb[105].mxu0  ;;  %v2191_v4 = vsel %vm214_vm1, %v4747_v27, 0.0 }
 0x8bf   : > { %2192 = vadd.xlane.f32.xlu1 %v2191_v4 }
 0x8c0   : > { %v4753_v22 = vadd.f32 %v2130_v50, %v4600_v49 }
 0x8c1   : > { %v2134_v28 = vpop.f32.mrb[106].mxu0 }
 0x8c2   : > { %v2135_v55 = vadd.f32 %v4663_v24, %v2134_v28  ;;  %v3351_v62 = vpop.f32.mrb[107].mxu0  ;;  %v2194_v12 = vsel %vm214_vm1, %v4753_v22, 0.0 }
 0x8c3   : > { %2195 = vadd.xlane.f32.xlu0 %v2194_v12 }
 0x8c4   : > { %v4759_v32 = vadd.f32 %v2135_v55, %v4609_v63 }
 0x8c5   : > { %v2139_v26 = vpop.f32.mrb[108].mxu0 }
 0x8c6   : > { %v2140_v36 = vadd.f32 %v4663_v24, %v2139_v26  ;;  %v3354_v13 = vpop.f32.mrb[109].mxu0  ;;  %v2197_v19 = vsel %vm214_vm1, %v4759_v32, 0.0 }
 0x8c7   : > { %2198 = vadd.xlane.f32.xlu1 %v2197_v19 }
 0x8c8   : > { %v4765_v49 = vadd.f32 %v2140_v36, %v4618_v11 }
 0x8c9   : > { %v2144_v5 = vpop.f32.mrb[110].mxu0 }
 0x8ca   : > { %v2145_v1 = vadd.f32 %v4663_v24, %v2144_v5  ;;  %v3357_v47 = vpop.f32.mrb[111].mxu0  ;;  %v2200_v7 = vsel %vm214_vm1, %v4765_v49, 0.0 }
 0x8cb   : > { %2201 = vadd.xlane.f32.xlu0 %v2200_v7 }
 0x8cc   : > { %v4771_v63 = vadd.f32 %v2145_v1, %v4627_v15 }
 0x8cd   : > { %v2149_v51 = vpop.f32.mrb[112].mxu0 }
 0x8ce   : > { %v2150_v41 = vadd.f32 %v4663_v24, %v2149_v51  ;;  %v3360_v23 = vpop.f32.mrb[113].mxu0  ;;  %v2203_v14 = vsel %vm214_vm1, %v4771_v63, 0.0 }
 0x8cf   : > { %2204 = vadd.xlane.f32.xlu1 %v2203_v14 }
 0x8d0   : > { %v4777_v11 = vadd.f32 %v2150_v41, %v4636_v2 }
 0x8d1   : > { %v2154_v40 = vpop.f32.mrb[114].mxu0 }
 0x8d2   : > { %v2155_v53 = vadd.f32 %v4663_v24, %v2154_v40  ;;  %v3363_v21 = vpop.f32.mrb[115].mxu0  ;;  %v2206_v25 = vsel %vm214_vm1, %v4777_v11, 0.0 }
 0x8d3   : > { %2207 = vadd.xlane.f32.xlu0 %v2206_v25 }
 0x8d4   : > { %v4783_v15 = vadd.f32 %v2155_v53, %v4645_v46 }
 0x8d5   : > { %v2159_v16 = vpop.f32.mrb[116].mxu0 }
 0x8d6   : > { %v2160_v48 = vadd.f32 %v4663_v24, %v2159_v16  ;;  %v3366_v17 = vpop.f32.mrb[117].mxu0  ;;  %v2209_v30 = vsel %vm214_vm1, %v4783_v15, 0.0 }
 0x8d7   : > { %2210 = vadd.xlane.f32.xlu1 %v2209_v30 }
 0x8d8   : > { %v4789_v2 = vadd.f32 %v2160_v48, %v4654_v44 }
 0x8da   : > { %v2212_v35 = vsel %vm1574_vm6, %v4789_v2, 0.0 }
 0x8db   : > { %2213 = vadd.xlane.f32.xlu0 %v2212_v35 }
 0x938   : > { %v2178_v31 = vpop.xlane.xlu0 %2177 }
 0x939   : > { %v2215_v39 = vmul.f32 0.03125, %v2178_v31 }
 0x93b   : > { %v4794_v46 = vsub.f32 %v4717_v29, %v2215_v39 }
 0x93c   : > { %v2181_v18 = vpop.xlane.xlu1 %2180 }
 0x93d   : > { %v2216_v61 = vmul.f32 0.03125, %v2181_v18  ;;  %v2241_v24 = vmul.f32 %v4794_v46, %v4794_v46 }
 0x93f   : > { %v4799_v20 = vsub.f32 %v4723_v34, %v2216_v61  ;;  %v2254_v44 = vsel %vm214_vm1, %v2241_v24, 0.0 }
 0x940   : > { %v2184_v56 = vpop.xlane.xlu0 %2183  ;;  %2255 = vadd.xlane.f32.xlu1 %v2254_v44 }
 0x941   : > { %v2217_v33 = vmul.f32 0.03125, %v2184_v56  ;;  %v2242_v38 = vmul.f32 %v4799_v20, %v4799_v20 }
 0x943   : > { %v4805_v37 = vsub.f32 %v4729_v9, %v2217_v33  ;;  %v2257_v29 = vsel %vm214_vm1, %v2242_v38, 0.0 }
 0x944   : > { %v2187_v45 = vpop.xlane.xlu1 %2186  ;;  %2258 = vadd.xlane.f32.xlu0 %v2257_v29 }
 0x945   : > { %v2218_v42 = vmul.f32 0.03125, %v2187_v45  ;;  %v2243_v34 = vmul.f32 %v4805_v37, %v4805_v37 }
 0x947   : > { %v4811_v0 = vsub.f32 %v4735_v59, %v2218_v42  ;;  %v2260_v43 = vsel %vm214_vm1, %v2243_v34, 0.0 }
 0x948   : > { %v2190_v54 = vpop.xlane.xlu0 %2189  ;;  %2261 = vadd.xlane.f32.xlu1 %v2260_v43 }
 0x949   : > { %v2219_v52 = vmul.f32 0.03125, %v2190_v54  ;;  %v2244_v9 = vmul.f32 %v4811_v0, %v4811_v0 }
 0x94b   : > { %v4817_v58 = vsub.f32 %v4741_v8, %v2219_v52  ;;  %v2263_v60 = vsel %vm214_vm1, %v2244_v9, 0.0  ;;  %v4874_v9 = vld [vmem:[%s4989_s1 + $0xc5] ss:$0 sm:$0xff] }
 0x94c   : > { %v2193_v10 = vpop.xlane.xlu1 %2192  ;;  %2264 = vadd.xlane.f32.xlu0 %v2263_v60 }
 0x94d   : > { %v2220_v50 = vmul.f32 0.03125, %v2193_v10  ;;  %v2245_v59 = vmul.f32 %v4817_v58, %v4817_v58 }
 0x94f   : > { %v4823_v57 = vsub.f32 %v4747_v27, %v2220_v50  ;;  %v2266_v4 = vsel %vm214_vm1, %v2245_v59, 0.0  ;;  %v4880_v59 = vld [vmem:[%s4989_s1 + $0xc6] ss:$0 sm:$0xff] }
 0x950   : > { %v2196_v28 = vpop.xlane.xlu0 %2195  ;;  %2267 = vadd.xlane.f32.xlu1 %v2266_v4 }
 0x951   : > { %v2221_v55 = vmul.f32 0.03125, %v2196_v28  ;;  %v2246_v8 = vmul.f32 %v4823_v57, %v4823_v57 }
 0x953   : > { %v4829_v62 = vsub.f32 %v4753_v22, %v2221_v55  ;;  %v2269_v12 = vsel %vm214_vm1, %v2246_v8, 0.0  ;;  %v171_v8 = vld [vmem:[%s4989_s1 + $0xc8] sm:$0xff] }
 0x954   : > { %v2199_v26 = vpop.xlane.xlu1 %2198  ;;  %2270 = vadd.xlane.f32.xlu0 %v2269_v12 }
 0x955   : > { %v2222_v36 = vmul.f32 0.03125, %v2199_v26  ;;  %v2247_v27 = vmul.f32 %v4829_v62, %v4829_v62 }
 0x957   : > { %v4835_v13 = vsub.f32 %v4759_v32, %v2222_v36  ;;  %v2272_v19 = vsel %vm214_vm1, %v2247_v27, 0.0 }
 0x958   : > { %v2202_v5 = vpop.xlane.xlu0 %2201  ;;  %2273 = vadd.xlane.f32.xlu1 %v2272_v19 }
 0x959   : > { %v2223_v1 = vmul.f32 0.03125, %v2202_v5  ;;  %v2248_v22 = vmul.f32 %v4835_v13, %v4835_v13 }
 0x95b   : > { %v4841_v47 = vsub.f32 %v4765_v49, %v2223_v1  ;;  %v2275_v7 = vsel %vm214_vm1, %v2248_v22, 0.0  ;;  %v172_v22 = vld [vmem:[%s4989_s1 + $0xd0] sm:$0xff] }
 0x95c   : > { %v2205_v51 = vpop.xlane.xlu1 %2204  ;;  %2276 = vadd.xlane.f32.xlu0 %v2275_v7 }
 0x95d   : > { %v2224_v41 = vmul.f32 0.03125, %v2205_v51  ;;  %v2249_v32 = vmul.f32 %v4841_v47, %v4841_v47 }
 0x95f   : > { %v4847_v23 = vsub.f32 %v4771_v63, %v2224_v41  ;;  %v2278_v14 = vsel %vm214_vm1, %v2249_v32, 0.0 }
 0x960   : > { %v2208_v40 = vpop.xlane.xlu0 %2207  ;;  %2279 = vadd.xlane.f32.xlu1 %v2278_v14 }
 0x961   : > { %v2225_v53 = vmul.f32 0.03125, %v2208_v40  ;;  %v2250_v49 = vmul.f32 %v4847_v23, %v4847_v23 }
 0x963   : > { %v4853_v21 = vsub.f32 %v4777_v11, %v2225_v53  ;;  %v2281_v25 = vsel %vm214_vm1, %v2250_v49, 0.0 }
 0x964   : > { %v2211_v16 = vpop.xlane.xlu1 %2210  ;;  %2282 = vadd.xlane.f32.xlu0 %v2281_v25  ;;  %v173_v25 = vld [vmem:[%s4989_s1 + $0xd8] sm:$0xff] }
 0x965   : > { %v2226_v48 = vmul.f32 0.03125, %v2211_v16  ;;  %v2251_v63 = vmul.f32 %v4853_v21, %v4853_v21 }
 0x967   : > { %v4859_v17 = vsub.f32 %v4783_v15, %v2226_v48  ;;  %v2284_v30 = vsel %vm214_vm1, %v2251_v63, 0.0 }
 0x968   : > { %2285 = vadd.xlane.f32.xlu1 %v2284_v30  ;;  %v2214_v35 = vpop.xlane.xlu0 %2213 }
 0x969   : > { %v2227_v31 = vmul.f32 0.03125, %v2214_v35  ;;  %v2252_v11 = vmul.f32 %v4859_v17, %v4859_v17 }
 0x96b   : > { %v4865_v39 = vsub.f32 %v4789_v2, %v2227_v31  ;;  %v2287_v18 = vsel %vm214_vm1, %v2252_v11, 0.0 }
 0x96c   : > { %2288 = vadd.xlane.f32.xlu0 %v2287_v18 }
 0x96d   : > { %v2253_v61 = vmul.f32 %v4865_v39, %v4865_v39 }
 0x96f   : > { %v2290_v15 = vsel %vm1574_vm6, %v2253_v61, 0.0  ;;  %v174_v61 = vld [vmem:[%s4989_s1 + $0xe0] sm:$0xff] }
 0x970   : > { %2291 = vadd.xlane.f32.xlu1 %v2290_v15 }
 0x9cd   : > { %v2256_v24 = vpop.xlane.xlu1 %2255 }
 0x9ce   : > { %v2293_v44 = vmul.f32 0.03125, %v2256_v24 }
 0x9d0   : > { %v2306_v56 = vadd.f32 1e-05, %v2293_v44 }
 0x9d1   : > { %v2259_v33 = vpop.xlane.xlu0 %2258 }
 0x9d2   : > { %3618 = vrsqrt.f32 %v2306_v56  ;;  %v2294_v38 = vmul.f32 0.03125, %v2259_v33 }
 0x9d4   : > { %v2307_v29 = vadd.f32 1e-05, %v2294_v38 }
 0x9d5   : > { %v2262_v45 = vpop.xlane.xlu1 %2261 }
 0x9d6   : > { %3620 = vrsqrt.f32 %v2307_v29  ;;  %v2295_v2 = vmul.f32 0.03125, %v2262_v45 }
 0x9d8   : > { %v2308_v42 = vadd.f32 1e-05, %v2295_v2  ;;  %v175_v2 = vld [vmem:[%s4989_s1 + $0xe8] sm:$0xff] }
 0x9d9   : > { %v2265_v34 = vpop.xlane.xlu0 %2264 }
 0x9da   : > { %3622 = vrsqrt.f32 %v2308_v42  ;;  %v2296_v43 = vmul.f32 0.03125, %v2265_v34 }
 0x9dc   : > { %v3619_v54 = vpop.eup %3618  ;;  %v2309_v52 = vadd.f32 1e-05, %v2296_v43 }
 0x9dd   : > { %v2268_v60 = vpop.xlane.xlu1 %2267  ;;  %v2332_v10 = vmul.f32 %v3619_v54, %v4794_v46 }
 0x9de   : > { %3624 = vrsqrt.f32 %v2309_v52  ;;  %v2297_v50 = vmul.f32 0.03125, %v2268_v60 }
 0x9df   : > { %v2349_v4 = vmul.f32 %v4874_v9, %v2332_v10 }
 0x9e0   : > { %v3621_v28 = vpop.eup %3620  ;;  %v2310_v55 = vadd.f32 1e-05, %v2297_v50 }
 0x9e1   : > { %v2271_v12 = vpop.xlane.xlu0 %2270  ;;  %v2366_v26 = vadd.f32 %v4880_v59, %v2349_v4  ;;  %v2333_v46 = vmul.f32 %v3621_v28, %v4799_v20  ;;  %v176_v4 = vld [vmem:[%s4989_s1 + $0xf0] sm:$0xff] }
 0x9e2   : > { %3626 = vrsqrt.f32 %v2310_v55  ;;  %v2298_v36 = vmul.f32 0.03125, %v2271_v12 }
 0x9e3   : > { %v2379_v27 = vmul.f32 %v2366_v26, %v171_v8  ;;  %v2350_v19 = vmul.f32 %v4874_v9, %v2333_v46 }
 0x9e4   : > { %v3623_v5 = vpop.eup %3622  ;;  %v2311_v1 = vadd.f32 1e-05, %v2298_v36 }
 0x9e5   : > { %v2274_v7 = vpop.xlane.xlu1 %2273  ;;  %v2392_v51 = vsel %vm214_vm1, %v2379_v27, 0.0  ;;  %v2367_v41 = vadd.f32 %v4880_v59, %v2350_v19  ;;  %v2334_v32 = vmul.f32 %v3623_v5, %v4805_v37  ;;  %v177_v19 = vld [vmem:[%s4989_s1 + $0xf8] sm:$0xff] }
 0x9e6   : > { %3628 = vrsqrt.f32 %v2311_v1  ;;  %v2299_v20 = vmul.f32 0.03125, %v2274_v7  ;;  %2393 = vadd.xlane.f32.xlu0 %v2392_v51 }
 0x9e7   : > { %v2380_v14 = vmul.f32 %v2367_v41, %v172_v22  ;;  %v2351_v40 = vmul.f32 %v4874_v9, %v2334_v32 }
 0x9e8   : > { %v3625_v53 = vpop.eup %3624  ;;  %v2312_v49 = vadd.f32 1e-05, %v2299_v20 }
 0x9e9   : > { %v2277_v16 = vpop.xlane.xlu0 %2276  ;;  %v2395_v48 = vsel %vm214_vm1, %v2380_v14, 0.0  ;;  %v2368_v63 = vadd.f32 %v4880_v59, %v2351_v40  ;;  %v2335_v30 = vmul.f32 %v3625_v53, %v4811_v0  ;;  %v178_v14 = vld [vmem:[%s4989_s1 + $0x100] sm:$0xff] }
 0x9ea   : > { %3630 = vrsqrt.f32 %v2312_v49  ;;  %v2300_v37 = vmul.f32 0.03125, %v2277_v16  ;;  %2396 = vadd.xlane.f32.xlu1 %v2395_v48 }
 0x9eb   : > { %v2381_v35 = vmul.f32 %v2368_v63, %v173_v25  ;;  %v2352_v31 = vmul.f32 %v4874_v9, %v2335_v30 }
 0x9ec   : > { %v3627_v11 = vpop.eup %3626  ;;  %v2313_v18 = vadd.f32 1e-05, %v2300_v37  ;;  %v179_v37 = vld [vmem:[%s4989_s1 + $0x108] sm:$0xff] }
 0x9ed   : > { %v2280_v15 = vpop.xlane.xlu1 %2279  ;;  %v2398_v24 = vsel %vm214_vm1, %v2381_v35, 0.0  ;;  %v2369_v44 = vadd.f32 %v4880_v59, %v2352_v31  ;;  %v2336_v56 = vmul.f32 %v3627_v11, %v4817_v58 }
 0x9ee   : > { %3632 = vrsqrt.f32 %v2313_v18  ;;  %v2301_v0 = vmul.f32 0.03125, %v2280_v15  ;;  %2399 = vadd.xlane.f32.xlu0 %v2398_v24  ;;  %v180_v15 = vld [vmem:[%s4989_s1 + $0x110] sm:$0xff] }
 0x9ef   : > { %v2382_v33 = vmul.f32 %v2369_v44, %v174_v61  ;;  %v2353_v38 = vmul.f32 %v4874_v9, %v2336_v56 }
 0x9f0   : > { %v3629_v29 = vpop.eup %3628  ;;  %v2314_v45 = vadd.f32 1e-05, %v2301_v0 }
 0x9f1   : > { %v2283_v42 = vpop.xlane.xlu0 %2282  ;;  %v2401_v34 = vsel %vm214_vm1, %v2382_v33, 0.0  ;;  %v2370_v43 = vadd.f32 %v4880_v59, %v2353_v38  ;;  %v2337_v54 = vmul.f32 %v3629_v29, %v4823_v57  ;;  %v181_v38 = vld [vmem:[%s4989_s1 + $0x118] sm:$0xff] }
 0x9f2   : > { %3634 = vrsqrt.f32 %v2314_v45  ;;  %v2302_v58 = vmul.f32 0.03125, %v2283_v42  ;;  %2402 = vadd.xlane.f32.xlu1 %v2401_v34 }
 0x9f3   : > { %v2383_v52 = vmul.f32 %v2370_v43, %v175_v2  ;;  %v2354_v60 = vmul.f32 %v4874_v9, %v2337_v54  ;;  %v182_v43 = vld [vmem:[%s4989_s1 + $0x120] sm:$0xff] }
 0x9f4   : > { %v3631_v10 = vpop.eup %3630  ;;  %v2315_v50 = vadd.f32 1e-05, %v2302_v58 }
 0x9f5   : > { %v2286_v28 = vpop.xlane.xlu1 %2285  ;;  %v2404_v55 = vsel %vm214_vm1, %v2383_v52, 0.0  ;;  %v2371_v8 = vadd.f32 %v4880_v59, %v2354_v60  ;;  %v2338_v12 = vmul.f32 %v3631_v10, %v4829_v62 }
 0x9f6   : > { %3636 = vrsqrt.f32 %v2315_v50  ;;  %v2303_v57 = vmul.f32 0.03125, %v2286_v28  ;;  %2405 = vadd.xlane.f32.xlu0 %v2404_v55 }
 0x9f7   : > { %v2384_v26 = vmul.f32 %v2371_v8, %v176_v4  ;;  %v2355_v46 = vmul.f32 %v4874_v9, %v2338_v12 }
 0x9f8   : > { %v3633_v36 = vpop.eup %3632  ;;  %v2316_v27 = vadd.f32 1e-05, %v2303_v57 }
 0x9f9   : > { %v2289_v5 = vpop.xlane.xlu0 %2288  ;;  %v2407_v1 = vsel %vm214_vm1, %v2384_v26, 0.0  ;;  %v2372_v22 = vadd.f32 %v4880_v59, %v2355_v46  ;;  %v2339_v7 = vmul.f32 %v3633_v36, %v4835_v13 }
 0x9fa   : > { %3638 = vrsqrt.f32 %v2316_v27  ;;  %v2304_v62 = vmul.f32 0.03125, %v2289_v5  ;;  %2408 = vadd.xlane.f32.xlu1 %v2407_v1 }
 0x9fb   : > { %v2385_v51 = vmul.f32 %v2372_v22, %v177_v19  ;;  %v2356_v41 = vmul.f32 %v4874_v9, %v2339_v7 }
 0x9fc   : > { %v3635_v32 = vpop.eup %3634  ;;  %v2317_v20 = vadd.f32 1e-05, %v2304_v62  ;;  %v2431_v62 = vlaneseq }
 0x9fd   : > { %v2292_v40 = vpop.xlane.xlu1 %2291  ;;  %v2410_v53 = vsel %vm214_vm1, %v2385_v51, 0.0  ;;  %v2373_v49 = vadd.f32 %v4880_v59, %v2356_v41  ;;  %v2340_v25 = vmul.f32 %v3635_v32, %v4841_v47 }
 0x9fe   : > { %3640 = vrsqrt.f32 %v2317_v20  ;;  %v2305_v13 = vmul.f32 0.03125, %v2292_v40  ;;  %2411 = vadd.xlane.f32.xlu0 %v2410_v53  ;;  %v2432_v51 = vshrl.u32 %v2431_v62, 7 }
 0x9ff   : > { %v2386_v16 = vmul.f32 %v2373_v49, %v178_v14  ;;  %v2357_v48 = vmul.f32 %v4874_v9, %v2340_v25 }
 0xa00   : > { %v3637_v63 = vpop.eup %3636  ;;  %v2318_v30 = vadd.f32 1e-05, %v2305_v13  ;;  %vm2433_vm0 = vcmp.eq.s32.totalorder %v2432_v51, 0 }
 0xa01   : > { %v2413_v35 = vsel %vm214_vm1, %v2386_v16, 0.0  ;;  %v2374_v31 = vadd.f32 %v4880_v59, %v2357_v48  ;;  %v2341_v11 = vmul.f32 %v3637_v63, %v4847_v23  ;;  %v2718_v14 = vsel %vm2433_vm0, 1.0, %v3654_v6 }
 0xa02   : > { %3642 = vrsqrt.f32 %v2318_v30  ;;  %2414 = vadd.xlane.f32.xlu1 %v2413_v35 }
 0xa03   : > { %v2387_v47 = vmul.f32 %v2374_v31, %v179_v37  ;;  %v2358_v18 = vmul.f32 %v4874_v9, %v2341_v11 }
 0xa04   : > { %v3639_v61 = vpop.eup %3638 }
 0xa05   : > { %v2416_v24 = vsel %vm214_vm1, %v2387_v47, 0.0  ;;  %v2375_v44 = vadd.f32 %v4880_v59, %v2358_v18  ;;  %v2342_v56 = vmul.f32 %v3639_v61, %v4853_v21 }
 0xa06   : > { %2417 = vadd.xlane.f32.xlu0 %v2416_v24 }
 0xa07   : > { %v2388_v0 = vmul.f32 %v2375_v44, %v180_v15  ;;  %v2359_v23 = vmul.f32 %v4874_v9, %v2342_v56 }
 0xa08   : > { %v3641_v33 = vpop.eup %3640 }
 0xa09   : > { %v2419_v29 = vsel %vm214_vm1, %v2388_v0, 0.0  ;;  %v2376_v45 = vadd.f32 %v4880_v59, %v2359_v23  ;;  %v2343_v2 = vmul.f32 %v3641_v33, %v4859_v17  ;;  %v183_v17 = vld [vmem:[%s4989_s1 + $0x128] sm:$0xf] }
 0xa0a   : > { %2420 = vadd.xlane.f32.xlu1 %v2419_v29 }
 0xa0b   : > { %v2389_v42 = vmul.f32 %v2376_v45, %v181_v38  ;;  %v2360_v34 = vmul.f32 %v4874_v9, %v2343_v2 }
 0xa0c   : > { %v3643_v21 = vpop.eup %3642 }
 0xa0d   : > { %v2422_v54 = vsel %vm214_vm1, %v2389_v42, 0.0  ;;  %v2377_v58 = vadd.f32 %v4880_v59, %v2360_v34  ;;  %v2344_v52 = vmul.f32 %v3643_v21, %v4865_v39 }
 0xa0e   : > { %2423 = vadd.xlane.f32.xlu0 %v2422_v54 }
 0xa0f   : > { %v2390_v60 = vmul.f32 %v2377_v58, %v182_v43  ;;  %v2361_v10 = vmul.f32 %v4874_v9, %v2344_v52 }
 0xa11   : > { %v2425_v50 = vsel %vm214_vm1, %v2390_v60, 0.0  ;;  %v2378_v4 = vadd.f32 %v4880_v59, %v2361_v10  ;;  %vm2512_vm1 = vcmask 0  }
 0xa12   : > { %2426 = vadd.xlane.f32.xlu1 %v2425_v50 }
 0xa13   : > { %v2391_v28 = vmul.f32 %v2378_v4, %v183_v17 }
 0xa15   : > { %v2428_v55 = vsel %vm1574_vm6, %v2391_v28, 0.0 }
 0xa16   : > { %2429 = vadd.xlane.f32.xlu0 %v2428_v55 }
 0xa73   : > { %v2394_v8 = vpop.xlane.xlu0 %2393 }
 0xa77   : > { %v2397_v12 = vpop.xlane.xlu1 %2396 }
 0xa78   : > { %v3481_v39 = vpack.c.bf16 %v2397_v12, %v2394_v8 }
 0xa7a   : > { %3482 = vmatpush3.bf16.msra.mxu1 %v3481_v39 }
 0xa7b   : > { %3483 = vmatprep.subr.bf16.mxu1 %v3652_v3  ;;  %v2400_v9 = vpop.xlane.xlu0 %2399 }
 0xa7f   : > { %v2403_v57 = vpop.xlane.xlu1 %2402 }
 0xa80   : > { %v3484_v26 = vpack.c.bf16 %v2403_v57, %v2400_v9 }
 0xa82   : > { %3485 = vmatpush3.bf16.msra.mxu1 %v3484_v26 }
 0xa83   : > { %3486 = vmatprep.subr.bf16.mxu1 %v3652_v3  ;;  %v2406_v46 = vpop.xlane.xlu0 %2405 }
 0xa87   : > { %v2409_v36 = vpop.xlane.xlu1 %2408 }
 0xa88   : > { %v3487_v59 = vpack.c.bf16 %v2409_v36, %v2406_v46 }
 0xa8a   : > { %3488 = vmatpush3.bf16.msra.mxu1 %v3487_v59 }
 0xa8b   : > { %3489 = vmatprep.subr.bf16.mxu1 %v3652_v3  ;;  %v2412_v27 = vpop.xlane.xlu0 %2411 }
 0xa8f   : > { %v2415_v19 = vpop.xlane.xlu1 %2414 }
 0xa90   : > { %v3490_v5 = vpack.c.bf16 %v2415_v19, %v2412_v27 }
 0xa92   : > { %3491 = vmatpush3.bf16.msra.mxu1 %v3490_v5 }
 0xa93   : > { %3492 = vmatprep.subr.bf16.mxu1 %v3652_v3  ;;  %v2418_v1 = vpop.xlane.xlu0 %2417 }
 0xa97   : > { %v2421_v22 = vpop.xlane.xlu1 %2420 }
 0xa98   : > { %v3493_v7 = vpack.c.bf16 %v2421_v22, %v2418_v1 }
 0xa9a   : > { %3494 = vmatpush3.bf16.msra.mxu1 %v3493_v7 }
 0xa9b   : > { %3495 = vmatprep.subr.bf16.mxu1 %v3652_v3  ;;  %v2424_v41 = vpop.xlane.xlu0 %2423 }
 0xa9f   : > { %v2427_v32 = vpop.xlane.xlu1 %2426 }
 0xaa0   : > { %v3496_v20 = vpack.c.bf16 %v2427_v32, %v2424_v41 }
 0xaa2   : > { %3497 = vmatpush3.bf16.msra.mxu1 %v3496_v20 }
 0xaa3   : > { %3391 = vmatprep.subr.mxu1 %v3654_v6  ;;  %v2430_v40 = vpop.xlane.xlu0 %2429 }
 0xaa6   : > { %3392 = vmatpush3.msk.msra.mxu1 %vm1218_vm3, %v2430_v40 }
 0xaa7   : > { %3394 = vmatmul.mubr.msk.f32.vlgmr.msra.gmra.mrb[116].mxu1 %vm1034_vm4, %v2718_v14 }
 0xb7a   : > { %v2508_v3 = vpop.f32.mrb[116].mxu1 }
 0xb7b   : > { %2513 = vst.msk [vmem:[%s139_s27] sm:$0x1] %vm2512_vm1, %v2508_v3  ;;  %v3395_v53 = vpop.f32.mrb[117].mxu1 }
 0xb7c PF: > { %s12_s9 = sadd.s32 1, %s3650_s9  }
 0xb7d   : > { %p9_p4 = scmp.ge.s32.totalorder %s12_s9, 4  }
 0xb7f   :  { %11 = sbr.rel (!%p9_p4) target bundleno = 1 (0x1), region = 58 }

</bundles_post_ra>
